<compile_context>
chip_gen: v7x
topology: tpu7x:2x2x1
jax: 0.10.0
libtpu: 0.0.40
codegen_flags: <defaults>
</compile_context>

<pallas_src>
import functools

import jax
import jax.numpy as jnp
from jax import lax
from jax.experimental import pallas as pl
from jax.experimental.pallas import tpu as pltpu

# ---------------- model hyper-parameters (small, deterministic) ----------------
VOCAB_SIZE = 64
EMBD_SIZE = 32
HEADS_NUM = 4
LAYERS_NUM = 2
BLOCK_SIZE = 8          # max sequence length
BATCH = 2
SEQ = 8                 # T (<= BLOCK_SIZE)
LN_EPS = 1e-5

HID = 4 * EMBD_SIZE     # FFN hidden dim = 128 (exactly one lane width)
VOCAB_PAD = 128         # lm_head output padded to full lane width; sliced outside


# ------------------------------ kernel helpers ----------------------------------
def _layer_norm(x, gamma, beta):
    # x: (N, E); gamma/beta: (1, E).  Biased variance (PyTorch LayerNorm).
    mu = jnp.mean(x, axis=-1, keepdims=True)
    var = jnp.mean((x - mu) ** 2, axis=-1, keepdims=True)
    return (x - mu) * lax.rsqrt(var + LN_EPS) * gamma + beta


# ------------------------------ fused GPT kernel --------------------------------
def gpt_kernel(b, t,
               idx_ref,          # (N, 1)  int32 token ids, N = B*T
               tok_ref,          # (V, E)  token embedding table
               pos_ref,          # (BLOCK_SIZE, E) positional embedding table
               ln_ref,           # (L, 4, E)  [ln1_g, ln1_b, ln2_g, ln2_b] per layer
               wqkv_ref,         # (L, E, 3E) fused Wq|Wk|Wv (no bias)
               wproj_ref,        # (L, E, E)
               bias_ref,         # (L, 3, 4E) row0[:E]=b_proj, row1=b_ffn1, row2[:E]=b_ffn2
               w1_ref,           # (L, E, 4E)
               w2_ref,           # (L, 4E, E)
               lnf_ref,          # (2, E)  [lnf_g, lnf_b]
               wlm_ref,          # (E, VOCAB_PAD)  (cols >= V are zero)
               blm_ref,          # (1, VOCAB_PAD)
               out_ref):         # (N, VOCAB_PAD) padded logits
    E = EMBD_SIZE
    H = HEADS_NUM
    hs = E // H
    n = b * t
    scale = float(E) ** -0.5     # reference Head scales by C**-0.5 with C = embd_size

    # ---------------- fused embedding gather (one-hot MXU matmuls) --------------
    ids = idx_ref[...]                                              # (N, 1) int32
    vcol = lax.broadcasted_iota(jnp.int32, (n, VOCAB_SIZE), 1)
    tok_oh = (ids == vcol).astype(jnp.float32)                      # (N, V)
    x = jnp.dot(tok_oh, tok_ref[...], preferred_element_type=jnp.float32)   # (N, E)

    trow = lax.broadcasted_iota(jnp.int32, (b, t, BLOCK_SIZE), 1)   # time index
    tcol = lax.broadcasted_iota(jnp.int32, (b, t, BLOCK_SIZE), 2)   # table column
    pos_oh = (trow == tcol).astype(jnp.float32).reshape(n, BLOCK_SIZE)
    x = x + jnp.dot(pos_oh, pos_ref[...], preferred_element_type=jnp.float32)

    # ---------------- causal additive mask, built once ---------------------------
    rr = lax.broadcasted_iota(jnp.int32, (t, t), 0)
    cc = lax.broadcasted_iota(jnp.int32, (t, t), 1)
    neg = jnp.where(cc <= rr, 0.0, -1e30).astype(jnp.float32)[None, :, :]   # (1, T, T)

    # ---------------- unrolled static layer loop (residual stays in vregs) -------
    for l in range(LAYERS_NUM):
        ln = ln_ref[l]                                              # (4, E)
        g1, b1 = ln[0:1, :], ln[1:2, :]
        g2, b2 = ln[2:3, :], ln[3:4, :]
        biases = bias_ref[l]                                        # (3, 4E)
        b_proj = biases[0:1, :E]                                    # (1, E)
        b_ffn1 = biases[1:2, :]                                     # (1, 4E)
        b_ffn2 = biases[2:3, :E]                                    # (1, E)

        # ---- multi-head causal self-attention on ln1(x), batched over H*B ------
        xln = _layer_norm(x, g1, b1)                                # (N, E)
        qkv = jnp.dot(xln, wqkv_ref[l],
                      preferred_element_type=jnp.float32)           # (N, 3E) one MXU pass
        qkv3 = qkv.reshape(b, t, 3 * E)                             # (B, T, 3E)

        # Split heads with static lane slices and stack them along the leading
        # (batch) axis -> (H*B, T, hs); avoids 4-D transposes.
        q = jnp.concatenate(
            [qkv3[:, :, h * hs:(h + 1) * hs] for h in range(H)], axis=0)
        k = jnp.concatenate(
            [qkv3[:, :, E + h * hs:E + (h + 1) * hs] for h in range(H)], axis=0)
        v = jnp.concatenate(
            [qkv3[:, :, 2 * E + h * hs:2 * E + (h + 1) * hs] for h in range(H)], axis=0)

        wei = jnp.einsum('btd,bsd->bts', q, k,
                         preferred_element_type=jnp.float32) * scale + neg   # (HB, T, T)
        wei = wei - jnp.max(wei, axis=-1, keepdims=True)
        p = jnp.exp(wei)
        p = p * pl.reciprocal(jnp.sum(p, axis=-1, keepdims=True), approx=True)
        # attention dropout: identity (eval mode)
        att = jnp.einsum('bts,bsd->btd', p, v,
                         preferred_element_type=jnp.float32)        # (HB, T, hs)

        # Head merge folded into output projection: sa = sum_h att_h @ Wproj[h]
        wproj = wproj_ref[l]                                        # (E, E)
        sa = None
        for h in range(H):
            att_h = att[h * b:(h + 1) * b].reshape(n, hs)           # leading-axis slice
            contrib = jnp.dot(att_h, wproj[h * hs:(h + 1) * hs, :],
                              preferred_element_type=jnp.float32)   # (N, E)
            sa = contrib if sa is None else sa + contrib
        # projection dropout: identity (eval mode)
        x = x + sa + b_proj                                         # residual 1

        # ---- feed-forward on ln2(x) ---------------------------------------------
        x2 = _layer_norm(x, g2, b2)
        hmid = jnp.dot(x2, w1_ref[l],
                       preferred_element_type=jnp.float32) + b_ffn1  # (N, 4E) lane-dense
        hmid = jnp.maximum(hmid, 0.0)                                # ReLU
        ff = jnp.dot(hmid, w2_ref[l],
                     preferred_element_type=jnp.float32) + b_ffn2
        # ffn dropout: identity (eval mode)
        x = x + ff                                                   # residual 2

    # ---------------- final LayerNorm + lm_head ----------------------------------
    lnf = lnf_ref[...]                                               # (2, E)
    xf = _layer_norm(x, lnf[0:1, :], lnf[1:2, :])
    logits = jnp.dot(xf, wlm_ref[...],
                     preferred_element_type=jnp.float32) + blm_ref[...]
    out_ref[...] = logits.astype(out_ref.dtype)                      # (N, 128) lane-dense


# ------------------------------ wrapper ------------------------------------------
@jax.jit
def gpt_forward(idx, params):
    """idx: int32 (B, T). Returns (logits (B, T, V), None) — mirrors targets=None path."""
    B, T = idx.shape
    N = B * T
    idx2d = idx.reshape(N, 1).astype(jnp.int32)

    kernel = functools.partial(gpt_kernel, B, T)
    vmem = pl.BlockSpec(memory_space=pltpu.MemorySpace.VMEM)   # whole arrays in VMEM (~100 KiB total)
    logits_pad = pl.pallas_call(
        kernel,
        out_shape=jax.ShapeDtypeStruct((N, VOCAB_PAD), jnp.float32),
        in_specs=[vmem] * 12,
        out_specs=vmem,
    )(idx2d, params['tok_table'], params['pos_table'], params['ln'],
      params['w_qkv'], params['w_proj'], params['biases'],
      params['w1'], params['w2'], params['lnf'], params['wlm'], params['blm'])

    logits = logits_pad[:, :VOCAB_SIZE].reshape(B, T, VOCAB_SIZE)
    return logits, None
    # TODO(synk): cross-entropy loss (targets path) and generate()/multinomial
    # sampling are not kernelized; only the targets=None forward pass is.


# ------------------------------ parameter init ----------------------------------
def init_params(key):
    E, V, L = EMBD_SIZE, VOCAB_SIZE, LAYERS_NUM

    def nrm(k, shape, scale=0.02):
        return jax.random.normal(k, shape, dtype=jnp.float32) * scale

    keys = jax.random.split(key, 7)
    # LayerNorm params per layer, packed as (L, 4, E): [ln1_g, ln1_b, ln2_g, ln2_b]
    ln_one = jnp.stack([jnp.ones((E,)), jnp.zeros((E,)),
                        jnp.ones((E,)), jnp.zeros((E,))]).astype(jnp.float32)
    wlm = jnp.zeros((E, VOCAB_PAD), jnp.float32).at[:, :V].set(nrm(keys[5], (E, V)))
    params = {
        'tok_table': nrm(keys[0], (V, E)),
        'pos_table': nrm(keys[1], (BLOCK_SIZE, E)),
        'ln': jnp.tile(ln_one[None, :, :], (L, 1, 1)),            # (L, 4, E)
        # per-head W_{q,k,v} fused along the output axis -> (E, 3E)
        'w_qkv': nrm(keys[2], (L, E, 3 * E)),
        'w_proj': nrm(keys[3], (L, E, E)),
        # packed biases (L, 3, 4E): row0[:E]=b_proj, row1=b_ffn1, row2[:E]=b_ffn2
        'biases': jnp.zeros((L, 3, HID), jnp.float32),
        'w1': nrm(keys[4], (L, E, HID)),
        'w2': nrm(keys[6], (L, HID, E)),
        'lnf': jnp.stack([jnp.ones((E,)), jnp.zeros((E,))]).astype(jnp.float32),  # (2, E)
        'wlm': wlm,                                               # (E, 128), cols >= V are 0
        'blm': jnp.zeros((1, VOCAB_PAD), jnp.float32),
    }
    return params


# ------------------------------ main ---------------------------------------------
if __name__ == "__main__":
    key = jax.random.PRNGKey(0)
    pkey, ikey = jax.random.split(key)
    params = init_params(pkey)
    idx = jax.random.randint(ikey, (BATCH, SEQ), 0, VOCAB_SIZE, dtype=jnp.int32)

    logits, loss = gpt_forward(idx, params)
    logits = jax.block_until_ready(logits)

    assert logits.shape == (BATCH, SEQ, VOCAB_SIZE), logits.shape
    assert loss is None
    assert bool(jnp.all(jnp.isfinite(logits)))
    print("KERNEL_OK")
</pallas_src>

<mosaic_0001>
module attributes {stable_mosaic.version = 11 : i64} {
  func.func @gpt_kernel(%arg0: memref<16x1xi32, #tpu.memory_space<vmem>>, %arg1: memref<64x32xf32, #tpu.memory_space<vmem>>, %arg2: memref<8x32xf32, #tpu.memory_space<vmem>>, %arg3: memref<2x4x32xf32, #tpu.memory_space<vmem>>, %arg4: memref<2x32x96xf32, #tpu.memory_space<vmem>>, %arg5: memref<2x32x32xf32, #tpu.memory_space<vmem>>, %arg6: memref<2x3x128xf32, #tpu.memory_space<vmem>>, %arg7: memref<2x32x128xf32, #tpu.memory_space<vmem>>, %arg8: memref<2x128x32xf32, #tpu.memory_space<vmem>>, %arg9: memref<2x32xf32, #tpu.memory_space<vmem>>, %arg10: memref<32x128xf32, #tpu.memory_space<vmem>>, %arg11: memref<1x128xf32, #tpu.memory_space<vmem>>, %arg12: memref<16x128xf32, #tpu.memory_space<vmem>>) attributes {dimension_semantics = [], scalar_prefetch = 0 : i64, scratch_operands = 0 : i64, tpu.core_type = #tpu.core_type<tc>} {
    %c0 = arith.constant 0 : index
    %c0_0 = arith.constant 0 : index
    %0 = vector.load %arg0[%c0, %c0_0] : memref<16x1xi32, #tpu.memory_space<vmem>>, vector<16x1xi32>
    %1 = tpu.iota {dimensions = array<i32: 1>} : vector<16x64xi32>
    %2 = vector.broadcast %0 : vector<16x1xi32> to vector<16x64xi32>
    %3 = arith.cmpi eq, %2, %1 : vector<16x64xi32>
    %4 = arith.extui %3 : vector<16x64xi1> to vector<16x64xi32>
    %5 = arith.sitofp %4 : vector<16x64xi32> to vector<16x64xf32>
    %c0_1 = arith.constant 0 : index
    %c0_2 = arith.constant 0 : index
    %6 = vector.load %arg1[%c0_1, %c0_2] : memref<64x32xf32, #tpu.memory_space<vmem>>, vector<64x32xf32>
    %cst = arith.constant dense<0.000000e+00> : vector<16x32xf32>
    %7 = tpu.matmul %5, %6, %cst {dimension_numbers = #tpu.dot_dimension_numbers<[1], [0], [0], [1], [0, 0, 1, 1], [], []>} : vector<16x64xf32>, vector<64x32xf32>, vector<16x32xf32> -> vector<16x32xf32>
    %8 = tpu.iota {dimensions = array<i32: 1>} : vector<2x8x8xi32>
    %9 = tpu.iota {dimensions = array<i32: 2>} : vector<2x8x8xi32>
    %10 = arith.cmpi eq, %8, %9 : vector<2x8x8xi32>
    %11 = arith.extui %10 : vector<2x8x8xi1> to vector<2x8x8xi32>
    %12 = arith.sitofp %11 : vector<2x8x8xi32> to vector<2x8x8xf32>
    %13 = vector.shape_cast %12 : vector<2x8x8xf32> to vector<16x8xf32>
    %c0_3 = arith.constant 0 : index
    %c0_4 = arith.constant 0 : index
    %14 = vector.load %arg2[%c0_3, %c0_4] : memref<8x32xf32, #tpu.memory_space<vmem>>, vector<8x32xf32>
    %cst_5 = arith.constant dense<0.000000e+00> : vector<16x32xf32>
    %15 = tpu.matmul %13, %14, %cst_5 {dimension_numbers = #tpu.dot_dimension_numbers<[1], [0], [0], [1], [0, 0, 1, 1], [], []>} : vector<16x8xf32>, vector<8x32xf32>, vector<16x32xf32> -> vector<16x32xf32>
    %16 = arith.addf %7, %15 : vector<16x32xf32>
    %17 = tpu.iota {dimensions = array<i32: 0>} : vector<8x8xi32>
    %18 = tpu.iota {dimensions = array<i32: 1>} : vector<8x8xi32>
    %19 = arith.cmpi sle, %18, %17 : vector<8x8xi32>
    %cst_6 = arith.constant 0.000000e+00 : f32
    %cst_7 = arith.constant -1.000000e+30 : f32
    %20 = vector.broadcast %cst_6 : f32 to vector<8x8xf32>
    %21 = vector.broadcast %cst_7 : f32 to vector<8x8xf32>
    %22 = arith.select %19, %20, %21 : vector<8x8xi1>, vector<8x8xf32>
    %23 = vector.shape_cast %22 : vector<8x8xf32> to vector<1x8x8xf32>
    %c0_8 = arith.constant 0 : index
    %c0_9 = arith.constant 0 : index
    %c0_10 = arith.constant 0 : index
    %24 = vector.load %arg3[%c0_8, %c0_9, %c0_10] : memref<2x4x32xf32, #tpu.memory_space<vmem>>, vector<1x4x32xf32>
    %25 = vector.shape_cast %24 : vector<1x4x32xf32> to vector<4x32xf32>
    %26 = vector.extract_strided_slice %25 {offsets = [0, 0], sizes = [1, 32], strides = [1, 1]} : vector<4x32xf32> to vector<1x32xf32>
    %27 = vector.extract_strided_slice %25 {offsets = [1, 0], sizes = [1, 32], strides = [1, 1]} : vector<4x32xf32> to vector<1x32xf32>
    %28 = vector.extract_strided_slice %25 {offsets = [2, 0], sizes = [1, 32], strides = [1, 1]} : vector<4x32xf32> to vector<1x32xf32>
    %29 = vector.extract_strided_slice %25 {offsets = [3, 0], sizes = [1, 32], strides = [1, 1]} : vector<4x32xf32> to vector<1x32xf32>
    %c0_11 = arith.constant 0 : index
    %c0_12 = arith.constant 0 : index
    %c0_13 = arith.constant 0 : index
    %30 = vector.load %arg6[%c0_11, %c0_12, %c0_13] : memref<2x3x128xf32, #tpu.memory_space<vmem>>, vector<1x3x128xf32>
    %31 = vector.shape_cast %30 : vector<1x3x128xf32> to vector<3x128xf32>
    %32 = vector.extract_strided_slice %31 {offsets = [0, 0], sizes = [1, 32], strides = [1, 1]} : vector<3x128xf32> to vector<1x32xf32>
    %33 = vector.extract_strided_slice %31 {offsets = [1, 0], sizes = [1, 128], strides = [1, 1]} : vector<3x128xf32> to vector<1x128xf32>
    %34 = vector.extract_strided_slice %31 {offsets = [2, 0], sizes = [1, 32], strides = [1, 1]} : vector<3x128xf32> to vector<1x32xf32>
    %cst_14 = arith.constant dense<0.000000e+00> : vector<16xf32>
    %35 = vector.multi_reduction <add>, %16, %cst_14 [1] : vector<16x32xf32> to vector<16xf32>
    %36 = vector.shape_cast %35 : vector<16xf32> to vector<16x1xf32>
    %cst_15 = arith.constant 3.200000e+01 : f32
    %37 = vector.broadcast %cst_15 : f32 to vector<16x1xf32>
    %38 = arith.divf %36, %37 : vector<16x1xf32>
    %39 = vector.broadcast %38 : vector<16x1xf32> to vector<16x32xf32>
    %40 = arith.subf %16, %39 : vector<16x32xf32>
    %41 = arith.mulf %40, %40 : vector<16x32xf32>
    %cst_16 = arith.constant dense<0.000000e+00> : vector<16xf32>
    %42 = vector.multi_reduction <add>, %41, %cst_16 [1] : vector<16x32xf32> to vector<16xf32>
    %43 = vector.shape_cast %42 : vector<16xf32> to vector<16x1xf32>
    %cst_17 = arith.constant 3.200000e+01 : f32
    %44 = vector.broadcast %cst_17 : f32 to vector<16x1xf32>
    %45 = arith.divf %43, %44 : vector<16x1xf32>
    %46 = vector.broadcast %38 : vector<16x1xf32> to vector<16x32xf32>
    %47 = arith.subf %16, %46 : vector<16x32xf32>
    %cst_18 = arith.constant 9.99999974E-6 : f32
    %48 = vector.broadcast %cst_18 : f32 to vector<16x1xf32>
    %49 = arith.addf %45, %48 : vector<16x1xf32>
    %50 = math.rsqrt %49 : vector<16x1xf32>
    %51 = vector.broadcast %50 : vector<16x1xf32> to vector<16x32xf32>
    %52 = arith.mulf %47, %51 : vector<16x32xf32>
    %53 = vector.broadcast %26 : vector<1x32xf32> to vector<16x32xf32>
    %54 = arith.mulf %52, %53 : vector<16x32xf32>
    %55 = vector.broadcast %27 : vector<1x32xf32> to vector<16x32xf32>
    %56 = arith.addf %54, %55 : vector<16x32xf32>
    %c0_19 = arith.constant 0 : index
    %c0_20 = arith.constant 0 : index
    %c0_21 = arith.constant 0 : index
    %57 = vector.load %arg4[%c0_19, %c0_20, %c0_21] : memref<2x32x96xf32, #tpu.memory_space<vmem>>, vector<1x32x96xf32>
    %58 = vector.shape_cast %57 : vector<1x32x96xf32> to vector<32x96xf32>
    %cst_22 = arith.constant dense<0.000000e+00> : vector<16x96xf32>
    %59 = tpu.matmul %56, %58, %cst_22 {dimension_numbers = #tpu.dot_dimension_numbers<[1], [0], [0], [1], [0, 0, 1, 1], [], []>} : vector<16x32xf32>, vector<32x96xf32>, vector<16x96xf32> -> vector<16x96xf32>
    %60 = vector.shape_cast %59 : vector<16x96xf32> to vector<2x8x96xf32>
    %61 = vector.extract_strided_slice %60 {offsets = [0, 0, 0], sizes = [2, 8, 8], strides = [1, 1, 1]} : vector<2x8x96xf32> to vector<2x8x8xf32>
    %62 = vector.extract_strided_slice %60 {offsets = [0, 0, 8], sizes = [2, 8, 8], strides = [1, 1, 1]} : vector<2x8x96xf32> to vector<2x8x8xf32>
    %63 = vector.extract_strided_slice %60 {offsets = [0, 0, 16], sizes = [2, 8, 8], strides = [1, 1, 1]} : vector<2x8x96xf32> to vector<2x8x8xf32>
    %64 = vector.extract_strided_slice %60 {offsets = [0, 0, 24], sizes = [2, 8, 8], strides = [1, 1, 1]} : vector<2x8x96xf32> to vector<2x8x8xf32>
    %65 = tpu.concatenate %61, %62, %63, %64 in 0 : vector<2x8x8xf32>, vector<2x8x8xf32>, vector<2x8x8xf32>, vector<2x8x8xf32> -> vector<8x8x8xf32>
    %66 = vector.extract_strided_slice %60 {offsets = [0, 0, 32], sizes = [2, 8, 8], strides = [1, 1, 1]} : vector<2x8x96xf32> to vector<2x8x8xf32>
    %67 = vector.extract_strided_slice %60 {offsets = [0, 0, 40], sizes = [2, 8, 8], strides = [1, 1, 1]} : vector<2x8x96xf32> to vector<2x8x8xf32>
    %68 = vector.extract_strided_slice %60 {offsets = [0, 0, 48], sizes = [2, 8, 8], strides = [1, 1, 1]} : vector<2x8x96xf32> to vector<2x8x8xf32>
    %69 = vector.extract_strided_slice %60 {offsets = [0, 0, 56], sizes = [2, 8, 8], strides = [1, 1, 1]} : vector<2x8x96xf32> to vector<2x8x8xf32>
    %70 = tpu.concatenate %66, %67, %68, %69 in 0 : vector<2x8x8xf32>, vector<2x8x8xf32>, vector<2x8x8xf32>, vector<2x8x8xf32> -> vector<8x8x8xf32>
    %71 = vector.extract_strided_slice %60 {offsets = [0, 0, 64], sizes = [2, 8, 8], strides = [1, 1, 1]} : vector<2x8x96xf32> to vector<2x8x8xf32>
    %72 = vector.extract_strided_slice %60 {offsets = [0, 0, 72], sizes = [2, 8, 8], strides = [1, 1, 1]} : vector<2x8x96xf32> to vector<2x8x8xf32>
    %73 = vector.extract_strided_slice %60 {offsets = [0, 0, 80], sizes = [2, 8, 8], strides = [1, 1, 1]} : vector<2x8x96xf32> to vector<2x8x8xf32>
    %74 = vector.extract_strided_slice %60 {offsets = [0, 0, 88], sizes = [2, 8, 8], strides = [1, 1, 1]} : vector<2x8x96xf32> to vector<2x8x8xf32>
    %75 = tpu.concatenate %71, %72, %73, %74 in 0 : vector<2x8x8xf32>, vector<2x8x8xf32>, vector<2x8x8xf32>, vector<2x8x8xf32> -> vector<8x8x8xf32>
    "tpu.trace_start"() <{level = 10 : i32, message = "btd,bsd->bts"}> : () -> ()
    %cst_23 = arith.constant dense<0.000000e+00> : vector<8x8x8xf32>
    %76 = tpu.matmul %65, %70, %cst_23 {dimension_numbers = #tpu.dot_dimension_numbers<[2], [2], [1], [1], [0, 0, 0, 1, 1, 1], [0], [0]>} : vector<8x8x8xf32>, vector<8x8x8xf32>, vector<8x8x8xf32> -> vector<8x8x8xf32>
    "tpu.trace_stop"() : () -> ()
    %cst_24 = arith.constant 0.176776692 : f32
    %77 = vector.broadcast %cst_24 : f32 to vector<8x8x8xf32>
    %78 = arith.mulf %76, %77 : vector<8x8x8xf32>
    %79 = vector.broadcast %23 : vector<1x8x8xf32> to vector<8x8x8xf32>
    %80 = arith.addf %78, %79 : vector<8x8x8xf32>
    %cst_25 = arith.constant dense<0xFF800000> : vector<8x8xf32>
    %81 = vector.multi_reduction <maximumf>, %80, %cst_25 [2] : vector<8x8x8xf32> to vector<8x8xf32>
    %82 = vector.shape_cast %81 : vector<8x8xf32> to vector<8x8x1xf32>
    %83 = vector.broadcast %82 : vector<8x8x1xf32> to vector<8x8x8xf32>
    %84 = arith.subf %80, %83 : vector<8x8x8xf32>
    %85 = math.exp %84 : vector<8x8x8xf32>
    %cst_26 = arith.constant dense<0.000000e+00> : vector<8x8xf32>
    %86 = vector.multi_reduction <add>, %85, %cst_26 [2] : vector<8x8x8xf32> to vector<8x8xf32>
    %87 = vector.shape_cast %86 : vector<8x8xf32> to vector<8x8x1xf32>
    %88 = tpu.reciprocal %87 {approx = true} : vector<8x8x1xf32> -> vector<8x8x1xf32>
    %89 = vector.broadcast %88 : vector<8x8x1xf32> to vector<8x8x8xf32>
    %90 = arith.mulf %85, %89 : vector<8x8x8xf32>
    "tpu.trace_start"() <{level = 10 : i32, message = "bts,bsd->btd"}> : () -> ()
    %cst_27 = arith.constant dense<0.000000e+00> : vector<8x8x8xf32>
    %91 = tpu.matmul %90, %75, %cst_27 {dimension_numbers = #tpu.dot_dimension_numbers<[2], [1], [1], [2], [0, 0, 0, 1, 1, 2], [0], [0]>} : vector<8x8x8xf32>, vector<8x8x8xf32>, vector<8x8x8xf32> -> vector<8x8x8xf32>
    "tpu.trace_stop"() : () -> ()
    %c0_28 = arith.constant 0 : index
    %c0_29 = arith.constant 0 : index
    %c0_30 = arith.constant 0 : index
    %92 = vector.load %arg5[%c0_28, %c0_29, %c0_30] : memref<2x32x32xf32, #tpu.memory_space<vmem>>, vector<1x32x32xf32>
    %93 = vector.shape_cast %92 : vector<1x32x32xf32> to vector<32x32xf32>
    %94 = vector.extract_strided_slice %91 {offsets = [0, 0, 0], sizes = [2, 8, 8], strides = [1, 1, 1]} : vector<8x8x8xf32> to vector<2x8x8xf32>
    %95 = vector.shape_cast %94 : vector<2x8x8xf32> to vector<16x8xf32>
    %96 = vector.extract_strided_slice %93 {offsets = [0, 0], sizes = [8, 32], strides = [1, 1]} : vector<32x32xf32> to vector<8x32xf32>
    %cst_31 = arith.constant dense<0.000000e+00> : vector<16x32xf32>
    %97 = tpu.matmul %95, %96, %cst_31 {dimension_numbers = #tpu.dot_dimension_numbers<[1], [0], [0], [1], [0, 0, 1, 1], [], []>} : vector<16x8xf32>, vector<8x32xf32>, vector<16x32xf32> -> vector<16x32xf32>
    %98 = vector.extract_strided_slice %91 {offsets = [2, 0, 0], sizes = [2, 8, 8], strides = [1, 1, 1]} : vector<8x8x8xf32> to vector<2x8x8xf32>
    %99 = vector.shape_cast %98 : vector<2x8x8xf32> to vector<16x8xf32>
    %100 = vector.extract_strided_slice %93 {offsets = [8, 0], sizes = [8, 32], strides = [1, 1]} : vector<32x32xf32> to vector<8x32xf32>
    %cst_32 = arith.constant dense<0.000000e+00> : vector<16x32xf32>
    %101 = tpu.matmul %99, %100, %cst_32 {dimension_numbers = #tpu.dot_dimension_numbers<[1], [0], [0], [1], [0, 0, 1, 1], [], []>} : vector<16x8xf32>, vector<8x32xf32>, vector<16x32xf32> -> vector<16x32xf32>
    %102 = arith.addf %97, %101 : vector<16x32xf32>
    %103 = vector.extract_strided_slice %91 {offsets = [4, 0, 0], sizes = [2, 8, 8], strides = [1, 1, 1]} : vector<8x8x8xf32> to vector<2x8x8xf32>
    %104 = vector.shape_cast %103 : vector<2x8x8xf32> to vector<16x8xf32>
    %105 = vector.extract_strided_slice %93 {offsets = [16, 0], sizes = [8, 32], strides = [1, 1]} : vector<32x32xf32> to vector<8x32xf32>
    %cst_33 = arith.constant dense<0.000000e+00> : vector<16x32xf32>
    %106 = tpu.matmul %104, %105, %cst_33 {dimension_numbers = #tpu.dot_dimension_numbers<[1], [0], [0], [1], [0, 0, 1, 1], [], []>} : vector<16x8xf32>, vector<8x32xf32>, vector<16x32xf32> -> vector<16x32xf32>
    %107 = arith.addf %102, %106 : vector<16x32xf32>
    %108 = vector.extract_strided_slice %91 {offsets = [6, 0, 0], sizes = [2, 8, 8], strides = [1, 1, 1]} : vector<8x8x8xf32> to vector<2x8x8xf32>
    %109 = vector.shape_cast %108 : vector<2x8x8xf32> to vector<16x8xf32>
    %110 = vector.extract_strided_slice %93 {offsets = [24, 0], sizes = [8, 32], strides = [1, 1]} : vector<32x32xf32> to vector<8x32xf32>
    %cst_34 = arith.constant dense<0.000000e+00> : vector<16x32xf32>
    %111 = tpu.matmul %109, %110, %cst_34 {dimension_numbers = #tpu.dot_dimension_numbers<[1], [0], [0], [1], [0, 0, 1, 1], [], []>} : vector<16x8xf32>, vector<8x32xf32>, vector<16x32xf32> -> vector<16x32xf32>
    %112 = arith.addf %107, %111 : vector<16x32xf32>
    %113 = arith.addf %16, %112 : vector<16x32xf32>
    %114 = vector.broadcast %32 : vector<1x32xf32> to vector<16x32xf32>
    %115 = arith.addf %113, %114 : vector<16x32xf32>
    %cst_35 = arith.constant dense<0.000000e+00> : vector<16xf32>
    %116 = vector.multi_reduction <add>, %115, %cst_35 [1] : vector<16x32xf32> to vector<16xf32>
    %117 = vector.shape_cast %116 : vector<16xf32> to vector<16x1xf32>
    %cst_36 = arith.constant 3.200000e+01 : f32
    %118 = vector.broadcast %cst_36 : f32 to vector<16x1xf32>
    %119 = arith.divf %117, %118 : vector<16x1xf32>
    %120 = vector.broadcast %119 : vector<16x1xf32> to vector<16x32xf32>
    %121 = arith.subf %115, %120 : vector<16x32xf32>
    %122 = arith.mulf %121, %121 : vector<16x32xf32>
    %cst_37 = arith.constant dense<0.000000e+00> : vector<16xf32>
    %123 = vector.multi_reduction <add>, %122, %cst_37 [1] : vector<16x32xf32> to vector<16xf32>
    %124 = vector.shape_cast %123 : vector<16xf32> to vector<16x1xf32>
    %cst_38 = arith.constant 3.200000e+01 : f32
    %125 = vector.broadcast %cst_38 : f32 to vector<16x1xf32>
    %126 = arith.divf %124, %125 : vector<16x1xf32>
    %127 = vector.broadcast %119 : vector<16x1xf32> to vector<16x32xf32>
    %128 = arith.subf %115, %127 : vector<16x32xf32>
    %cst_39 = arith.constant 9.99999974E-6 : f32
    %129 = vector.broadcast %cst_39 : f32 to vector<16x1xf32>
    %130 = arith.addf %126, %129 : vector<16x1xf32>
    %131 = math.rsqrt %130 : vector<16x1xf32>
    %132 = vector.broadcast %131 : vector<16x1xf32> to vector<16x32xf32>
    %133 = arith.mulf %128, %132 : vector<16x32xf32>
    %134 = vector.broadcast %28 : vector<1x32xf32> to vector<16x32xf32>
    %135 = arith.mulf %133, %134 : vector<16x32xf32>
    %136 = vector.broadcast %29 : vector<1x32xf32> to vector<16x32xf32>
    %137 = arith.addf %135, %136 : vector<16x32xf32>
    %c0_40 = arith.constant 0 : index
    %c0_41 = arith.constant 0 : index
    %c0_42 = arith.constant 0 : index
    %138 = vector.load %arg7[%c0_40, %c0_41, %c0_42] : memref<2x32x128xf32, #tpu.memory_space<vmem>>, vector<1x32x128xf32>
    %139 = vector.shape_cast %138 : vector<1x32x128xf32> to vector<32x128xf32>
    %cst_43 = arith.constant dense<0.000000e+00> : vector<16x128xf32>
    %140 = tpu.matmul %137, %139, %cst_43 {dimension_numbers = #tpu.dot_dimension_numbers<[1], [0], [0], [1], [0, 0, 1, 1], [], []>} : vector<16x32xf32>, vector<32x128xf32>, vector<16x128xf32> -> vector<16x128xf32>
    %141 = vector.broadcast %33 : vector<1x128xf32> to vector<16x128xf32>
    %142 = arith.addf %140, %141 : vector<16x128xf32>
    %cst_44 = arith.constant 0.000000e+00 : f32
    %143 = vector.broadcast %cst_44 : f32 to vector<16x128xf32>
    %144 = arith.maximumf %142, %143 : vector<16x128xf32>
    %c0_45 = arith.constant 0 : index
    %c0_46 = arith.constant 0 : index
    %c0_47 = arith.constant 0 : index
    %145 = vector.load %arg8[%c0_45, %c0_46, %c0_47] : memref<2x128x32xf32, #tpu.memory_space<vmem>>, vector<1x128x32xf32>
    %146 = vector.shape_cast %145 : vector<1x128x32xf32> to vector<128x32xf32>
    %cst_48 = arith.constant dense<0.000000e+00> : vector<16x32xf32>
    %147 = tpu.matmul %144, %146, %cst_48 {dimension_numbers = #tpu.dot_dimension_numbers<[1], [0], [0], [1], [0, 0, 1, 1], [], []>} : vector<16x128xf32>, vector<128x32xf32>, vector<16x32xf32> -> vector<16x32xf32>
    %148 = vector.broadcast %34 : vector<1x32xf32> to vector<16x32xf32>
    %149 = arith.addf %147, %148 : vector<16x32xf32>
    %150 = arith.addf %115, %149 : vector<16x32xf32>
    %c1 = arith.constant 1 : index
    %c0_49 = arith.constant 0 : index
    %c0_50 = arith.constant 0 : index
    %151 = vector.load %arg3[%c1, %c0_49, %c0_50] : memref<2x4x32xf32, #tpu.memory_space<vmem>>, vector<1x4x32xf32>
    %152 = vector.shape_cast %151 : vector<1x4x32xf32> to vector<4x32xf32>
    %153 = vector.extract_strided_slice %152 {offsets = [0, 0], sizes = [1, 32], strides = [1, 1]} : vector<4x32xf32> to vector<1x32xf32>
    %154 = vector.extract_strided_slice %152 {offsets = [1, 0], sizes = [1, 32], strides = [1, 1]} : vector<4x32xf32> to vector<1x32xf32>
    %155 = vector.extract_strided_slice %152 {offsets = [2, 0], sizes = [1, 32], strides = [1, 1]} : vector<4x32xf32> to vector<1x32xf32>
    %156 = vector.extract_strided_slice %152 {offsets = [3, 0], sizes = [1, 32], strides = [1, 1]} : vector<4x32xf32> to vector<1x32xf32>
    %c1_51 = arith.constant 1 : index
    %c0_52 = arith.constant 0 : index
    %c0_53 = arith.constant 0 : index
    %157 = vector.load %arg6[%c1_51, %c0_52, %c0_53] : memref<2x3x128xf32, #tpu.memory_space<vmem>>, vector<1x3x128xf32>
    %158 = vector.shape_cast %157 : vector<1x3x128xf32> to vector<3x128xf32>
    %159 = vector.extract_strided_slice %158 {offsets = [0, 0], sizes = [1, 32], strides = [1, 1]} : vector<3x128xf32> to vector<1x32xf32>
    %160 = vector.extract_strided_slice %158 {offsets = [1, 0], sizes = [1, 128], strides = [1, 1]} : vector<3x128xf32> to vector<1x128xf32>
    %161 = vector.extract_strided_slice %158 {offsets = [2, 0], sizes = [1, 32], strides = [1, 1]} : vector<3x128xf32> to vector<1x32xf32>
    %cst_54 = arith.constant dense<0.000000e+00> : vector<16xf32>
    %162 = vector.multi_reduction <add>, %150, %cst_54 [1] : vector<16x32xf32> to vector<16xf32>
    %163 = vector.shape_cast %162 : vector<16xf32> to vector<16x1xf32>
    %cst_55 = arith.constant 3.200000e+01 : f32
    %164 = vector.broadcast %cst_55 : f32 to vector<16x1xf32>
    %165 = arith.divf %163, %164 : vector<16x1xf32>
    %166 = vector.broadcast %165 : vector<16x1xf32> to vector<16x32xf32>
    %167 = arith.subf %150, %166 : vector<16x32xf32>
    %168 = arith.mulf %167, %167 : vector<16x32xf32>
    %cst_56 = arith.constant dense<0.000000e+00> : vector<16xf32>
    %169 = vector.multi_reduction <add>, %168, %cst_56 [1] : vector<16x32xf32> to vector<16xf32>
    %170 = vector.shape_cast %169 : vector<16xf32> to vector<16x1xf32>
    %cst_57 = arith.constant 3.200000e+01 : f32
    %171 = vector.broadcast %cst_57 : f32 to vector<16x1xf32>
    %172 = arith.divf %170, %171 : vector<16x1xf32>
    %173 = vector.broadcast %165 : vector<16x1xf32> to vector<16x32xf32>
    %174 = arith.subf %150, %173 : vector<16x32xf32>
    %cst_58 = arith.constant 9.99999974E-6 : f32
    %175 = vector.broadcast %cst_58 : f32 to vector<16x1xf32>
    %176 = arith.addf %172, %175 : vector<16x1xf32>
    %177 = math.rsqrt %176 : vector<16x1xf32>
    %178 = vector.broadcast %177 : vector<16x1xf32> to vector<16x32xf32>
    %179 = arith.mulf %174, %178 : vector<16x32xf32>
    %180 = vector.broadcast %153 : vector<1x32xf32> to vector<16x32xf32>
    %181 = arith.mulf %179, %180 : vector<16x32xf32>
    %182 = vector.broadcast %154 : vector<1x32xf32> to vector<16x32xf32>
    %183 = arith.addf %181, %182 : vector<16x32xf32>
    %c1_59 = arith.constant 1 : index
    %c0_60 = arith.constant 0 : index
    %c0_61 = arith.constant 0 : index
    %184 = vector.load %arg4[%c1_59, %c0_60, %c0_61] : memref<2x32x96xf32, #tpu.memory_space<vmem>>, vector<1x32x96xf32>
    %185 = vector.shape_cast %184 : vector<1x32x96xf32> to vector<32x96xf32>
    %cst_62 = arith.constant dense<0.000000e+00> : vector<16x96xf32>
    %186 = tpu.matmul %183, %185, %cst_62 {dimension_numbers = #tpu.dot_dimension_numbers<[1], [0], [0], [1], [0, 0, 1, 1], [], []>} : vector<16x32xf32>, vector<32x96xf32>, vector<16x96xf32> -> vector<16x96xf32>
    %187 = vector.shape_cast %186 : vector<16x96xf32> to vector<2x8x96xf32>
    %188 = vector.extract_strided_slice %187 {offsets = [0, 0, 0], sizes = [2, 8, 8], strides = [1, 1, 1]} : vector<2x8x96xf32> to vector<2x8x8xf32>
    %189 = vector.extract_strided_slice %187 {offsets = [0, 0, 8], sizes = [2, 8, 8], strides = [1, 1, 1]} : vector<2x8x96xf32> to vector<2x8x8xf32>
    %190 = vector.extract_strided_slice %187 {offsets = [0, 0, 16], sizes = [2, 8, 8], strides = [1, 1, 1]} : vector<2x8x96xf32> to vector<2x8x8xf32>
    %191 = vector.extract_strided_slice %187 {offsets = [0, 0, 24], sizes = [2, 8, 8], strides = [1, 1, 1]} : vector<2x8x96xf32> to vector<2x8x8xf32>
    %192 = tpu.concatenate %188, %189, %190, %191 in 0 : vector<2x8x8xf32>, vector<2x8x8xf32>, vector<2x8x8xf32>, vector<2x8x8xf32> -> vector<8x8x8xf32>
    %193 = vector.extract_strided_slice %187 {offsets = [0, 0, 32], sizes = [2, 8, 8], strides = [1, 1, 1]} : vector<2x8x96xf32> to vector<2x8x8xf32>
    %194 = vector.extract_strided_slice %187 {offsets = [0, 0, 40], sizes = [2, 8, 8], strides = [1, 1, 1]} : vector<2x8x96xf32> to vector<2x8x8xf32>
    %195 = vector.extract_strided_slice %187 {offsets = [0, 0, 48], sizes = [2, 8, 8], strides = [1, 1, 1]} : vector<2x8x96xf32> to vector<2x8x8xf32>
    %196 = vector.extract_strided_slice %187 {offsets = [0, 0, 56], sizes = [2, 8, 8], strides = [1, 1, 1]} : vector<2x8x96xf32> to vector<2x8x8xf32>
    %197 = tpu.concatenate %193, %194, %195, %196 in 0 : vector<2x8x8xf32>, vector<2x8x8xf32>, vector<2x8x8xf32>, vector<2x8x8xf32> -> vector<8x8x8xf32>
    %198 = vector.extract_strided_slice %187 {offsets = [0, 0, 64], sizes = [2, 8, 8], strides = [1, 1, 1]} : vector<2x8x96xf32> to vector<2x8x8xf32>
    %199 = vector.extract_strided_slice %187 {offsets = [0, 0, 72], sizes = [2, 8, 8], strides = [1, 1, 1]} : vector<2x8x96xf32> to vector<2x8x8xf32>
    %200 = vector.extract_strided_slice %187 {offsets = [0, 0, 80], sizes = [2, 8, 8], strides = [1, 1, 1]} : vector<2x8x96xf32> to vector<2x8x8xf32>
    %201 = vector.extract_strided_slice %187 {offsets = [0, 0, 88], sizes = [2, 8, 8], strides = [1, 1, 1]} : vector<2x8x96xf32> to vector<2x8x8xf32>
    %202 = tpu.concatenate %198, %199, %200, %201 in 0 : vector<2x8x8xf32>, vector<2x8x8xf32>, vector<2x8x8xf32>, vector<2x8x8xf32> -> vector<8x8x8xf32>
    "tpu.trace_start"() <{level = 10 : i32, message = "btd,bsd->bts"}> : () -> ()
    %cst_63 = arith.constant dense<0.000000e+00> : vector<8x8x8xf32>
    %203 = tpu.matmul %192, %197, %cst_63 {dimension_numbers = #tpu.dot_dimension_numbers<[2], [2], [1], [1], [0, 0, 0, 1, 1, 1], [0], [0]>} : vector<8x8x8xf32>, vector<8x8x8xf32>, vector<8x8x8xf32> -> vector<8x8x8xf32>
    "tpu.trace_stop"() : () -> ()
    %cst_64 = arith.constant 0.176776692 : f32
    %204 = vector.broadcast %cst_64 : f32 to vector<8x8x8xf32>
    %205 = arith.mulf %203, %204 : vector<8x8x8xf32>
    %206 = vector.broadcast %23 : vector<1x8x8xf32> to vector<8x8x8xf32>
    %207 = arith.addf %205, %206 : vector<8x8x8xf32>
    %cst_65 = arith.constant dense<0xFF800000> : vector<8x8xf32>
    %208 = vector.multi_reduction <maximumf>, %207, %cst_65 [2] : vector<8x8x8xf32> to vector<8x8xf32>
    %209 = vector.shape_cast %208 : vector<8x8xf32> to vector<8x8x1xf32>
    %210 = vector.broadcast %209 : vector<8x8x1xf32> to vector<8x8x8xf32>
    %211 = arith.subf %207, %210 : vector<8x8x8xf32>
    %212 = math.exp %211 : vector<8x8x8xf32>
    %cst_66 = arith.constant dense<0.000000e+00> : vector<8x8xf32>
    %213 = vector.multi_reduction <add>, %212, %cst_66 [2] : vector<8x8x8xf32> to vector<8x8xf32>
    %214 = vector.shape_cast %213 : vector<8x8xf32> to vector<8x8x1xf32>
    %215 = tpu.reciprocal %214 {approx = true} : vector<8x8x1xf32> -> vector<8x8x1xf32>
    %216 = vector.broadcast %215 : vector<8x8x1xf32> to vector<8x8x8xf32>
    %217 = arith.mulf %212, %216 : vector<8x8x8xf32>
    "tpu.trace_start"() <{level = 10 : i32, message = "bts,bsd->btd"}> : () -> ()
    %cst_67 = arith.constant dense<0.000000e+00> : vector<8x8x8xf32>
    %218 = tpu.matmul %217, %202, %cst_67 {dimension_numbers = #tpu.dot_dimension_numbers<[2], [1], [1], [2], [0, 0, 0, 1, 1, 2], [0], [0]>} : vector<8x8x8xf32>, vector<8x8x8xf32>, vector<8x8x8xf32> -> vector<8x8x8xf32>
    "tpu.trace_stop"() : () -> ()
    %c1_68 = arith.constant 1 : index
    %c0_69 = arith.constant 0 : index
    %c0_70 = arith.constant 0 : index
    %219 = vector.load %arg5[%c1_68, %c0_69, %c0_70] : memref<2x32x32xf32, #tpu.memory_space<vmem>>, vector<1x32x32xf32>
    %220 = vector.shape_cast %219 : vector<1x32x32xf32> to vector<32x32xf32>
    %221 = vector.extract_strided_slice %218 {offsets = [0, 0, 0], sizes = [2, 8, 8], strides = [1, 1, 1]} : vector<8x8x8xf32> to vector<2x8x8xf32>
    %222 = vector.shape_cast %221 : vector<2x8x8xf32> to vector<16x8xf32>
    %223 = vector.extract_strided_slice %220 {offsets = [0, 0], sizes = [8, 32], strides = [1, 1]} : vector<32x32xf32> to vector<8x32xf32>
    %cst_71 = arith.constant dense<0.000000e+00> : vector<16x32xf32>
    %224 = tpu.matmul %222, %223, %cst_71 {dimension_numbers = #tpu.dot_dimension_numbers<[1], [0], [0], [1], [0, 0, 1, 1], [], []>} : vector<16x8xf32>, vector<8x32xf32>, vector<16x32xf32> -> vector<16x32xf32>
    %225 = vector.extract_strided_slice %218 {offsets = [2, 0, 0], sizes = [2, 8, 8], strides = [1, 1, 1]} : vector<8x8x8xf32> to vector<2x8x8xf32>
    %226 = vector.shape_cast %225 : vector<2x8x8xf32> to vector<16x8xf32>
    %227 = vector.extract_strided_slice %220 {offsets = [8, 0], sizes = [8, 32], strides = [1, 1]} : vector<32x32xf32> to vector<8x32xf32>
    %cst_72 = arith.constant dense<0.000000e+00> : vector<16x32xf32>
    %228 = tpu.matmul %226, %227, %cst_72 {dimension_numbers = #tpu.dot_dimension_numbers<[1], [0], [0], [1], [0, 0, 1, 1], [], []>} : vector<16x8xf32>, vector<8x32xf32>, vector<16x32xf32> -> vector<16x32xf32>
    %229 = arith.addf %224, %228 : vector<16x32xf32>
    %230 = vector.extract_strided_slice %218 {offsets = [4, 0, 0], sizes = [2, 8, 8], strides = [1, 1, 1]} : vector<8x8x8xf32> to vector<2x8x8xf32>
    %231 = vector.shape_cast %230 : vector<2x8x8xf32> to vector<16x8xf32>
    %232 = vector.extract_strided_slice %220 {offsets = [16, 0], sizes = [8, 32], strides = [1, 1]} : vector<32x32xf32> to vector<8x32xf32>
    %cst_73 = arith.constant dense<0.000000e+00> : vector<16x32xf32>
    %233 = tpu.matmul %231, %232, %cst_73 {dimension_numbers = #tpu.dot_dimension_numbers<[1], [0], [0], [1], [0, 0, 1, 1], [], []>} : vector<16x8xf32>, vector<8x32xf32>, vector<16x32xf32> -> vector<16x32xf32>
    %234 = arith.addf %229, %233 : vector<16x32xf32>
    %235 = vector.extract_strided_slice %218 {offsets = [6, 0, 0], sizes = [2, 8, 8], strides = [1, 1, 1]} : vector<8x8x8xf32> to vector<2x8x8xf32>
    %236 = vector.shape_cast %235 : vector<2x8x8xf32> to vector<16x8xf32>
    %237 = vector.extract_strided_slice %220 {offsets = [24, 0], sizes = [8, 32], strides = [1, 1]} : vector<32x32xf32> to vector<8x32xf32>
    %cst_74 = arith.constant dense<0.000000e+00> : vector<16x32xf32>
    %238 = tpu.matmul %236, %237, %cst_74 {dimension_numbers = #tpu.dot_dimension_numbers<[1], [0], [0], [1], [0, 0, 1, 1], [], []>} : vector<16x8xf32>, vector<8x32xf32>, vector<16x32xf32> -> vector<16x32xf32>
    %239 = arith.addf %234, %238 : vector<16x32xf32>
    %240 = arith.addf %150, %239 : vector<16x32xf32>
    %241 = vector.broadcast %159 : vector<1x32xf32> to vector<16x32xf32>
    %242 = arith.addf %240, %241 : vector<16x32xf32>
    %cst_75 = arith.constant dense<0.000000e+00> : vector<16xf32>
    %243 = vector.multi_reduction <add>, %242, %cst_75 [1] : vector<16x32xf32> to vector<16xf32>
    %244 = vector.shape_cast %243 : vector<16xf32> to vector<16x1xf32>
    %cst_76 = arith.constant 3.200000e+01 : f32
    %245 = vector.broadcast %cst_76 : f32 to vector<16x1xf32>
    %246 = arith.divf %244, %245 : vector<16x1xf32>
    %247 = vector.broadcast %246 : vector<16x1xf32> to vector<16x32xf32>
    %248 = arith.subf %242, %247 : vector<16x32xf32>
    %249 = arith.mulf %248, %248 : vector<16x32xf32>
    %cst_77 = arith.constant dense<0.000000e+00> : vector<16xf32>
    %250 = vector.multi_reduction <add>, %249, %cst_77 [1] : vector<16x32xf32> to vector<16xf32>
    %251 = vector.shape_cast %250 : vector<16xf32> to vector<16x1xf32>
    %cst_78 = arith.constant 3.200000e+01 : f32
    %252 = vector.broadcast %cst_78 : f32 to vector<16x1xf32>
    %253 = arith.divf %251, %252 : vector<16x1xf32>
    %254 = vector.broadcast %246 : vector<16x1xf32> to vector<16x32xf32>
    %255 = arith.subf %242, %254 : vector<16x32xf32>
    %cst_79 = arith.constant 9.99999974E-6 : f32
    %256 = vector.broadcast %cst_79 : f32 to vector<16x1xf32>
    %257 = arith.addf %253, %256 : vector<16x1xf32>
    %258 = math.rsqrt %257 : vector<16x1xf32>
    %259 = vector.broadcast %258 : vector<16x1xf32> to vector<16x32xf32>
    %260 = arith.mulf %255, %259 : vector<16x32xf32>
    %261 = vector.broadcast %155 : vector<1x32xf32> to vector<16x32xf32>
    %262 = arith.mulf %260, %261 : vector<16x32xf32>
    %263 = vector.broadcast %156 : vector<1x32xf32> to vector<16x32xf32>
    %264 = arith.addf %262, %263 : vector<16x32xf32>
    %c1_80 = arith.constant 1 : index
    %c0_81 = arith.constant 0 : index
    %c0_82 = arith.constant 0 : index
    %265 = vector.load %arg7[%c1_80, %c0_81, %c0_82] : memref<2x32x128xf32, #tpu.memory_space<vmem>>, vector<1x32x128xf32>
    %266 = vector.shape_cast %265 : vector<1x32x128xf32> to vector<32x128xf32>
    %cst_83 = arith.constant dense<0.000000e+00> : vector<16x128xf32>
    %267 = tpu.matmul %264, %266, %cst_83 {dimension_numbers = #tpu.dot_dimension_numbers<[1], [0], [0], [1], [0, 0, 1, 1], [], []>} : vector<16x32xf32>, vector<32x128xf32>, vector<16x128xf32> -> vector<16x128xf32>
    %268 = vector.broadcast %160 : vector<1x128xf32> to vector<16x128xf32>
    %269 = arith.addf %267, %268 : vector<16x128xf32>
    %cst_84 = arith.constant 0.000000e+00 : f32
    %270 = vector.broadcast %cst_84 : f32 to vector<16x128xf32>
    %271 = arith.maximumf %269, %270 : vector<16x128xf32>
    %c1_85 = arith.constant 1 : index
    %c0_86 = arith.constant 0 : index
    %c0_87 = arith.constant 0 : index
    %272 = vector.load %arg8[%c1_85, %c0_86, %c0_87] : memref<2x128x32xf32, #tpu.memory_space<vmem>>, vector<1x128x32xf32>
    %273 = vector.shape_cast %272 : vector<1x128x32xf32> to vector<128x32xf32>
    %cst_88 = arith.constant dense<0.000000e+00> : vector<16x32xf32>
    %274 = tpu.matmul %271, %273, %cst_88 {dimension_numbers = #tpu.dot_dimension_numbers<[1], [0], [0], [1], [0, 0, 1, 1], [], []>} : vector<16x128xf32>, vector<128x32xf32>, vector<16x32xf32> -> vector<16x32xf32>
    %275 = vector.broadcast %161 : vector<1x32xf32> to vector<16x32xf32>
    %276 = arith.addf %274, %275 : vector<16x32xf32>
    %277 = arith.addf %242, %276 : vector<16x32xf32>
    %c0_89 = arith.constant 0 : index
    %c0_90 = arith.constant 0 : index
    %278 = vector.load %arg9[%c0_89, %c0_90] : memref<2x32xf32, #tpu.memory_space<vmem>>, vector<2x32xf32>
    %279 = vector.extract_strided_slice %278 {offsets = [0, 0], sizes = [1, 32], strides = [1, 1]} : vector<2x32xf32> to vector<1x32xf32>
    %280 = vector.extract_strided_slice %278 {offsets = [1, 0], sizes = [1, 32], strides = [1, 1]} : vector<2x32xf32> to vector<1x32xf32>
    %cst_91 = arith.constant dense<0.000000e+00> : vector<16xf32>
    %281 = vector.multi_reduction <add>, %277, %cst_91 [1] : vector<16x32xf32> to vector<16xf32>
    %282 = vector.shape_cast %281 : vector<16xf32> to vector<16x1xf32>
    %cst_92 = arith.constant 3.200000e+01 : f32
    %283 = vector.broadcast %cst_92 : f32 to vector<16x1xf32>
    %284 = arith.divf %282, %283 : vector<16x1xf32>
    %285 = vector.broadcast %284 : vector<16x1xf32> to vector<16x32xf32>
    %286 = arith.subf %277, %285 : vector<16x32xf32>
    %287 = arith.mulf %286, %286 : vector<16x32xf32>
    %cst_93 = arith.constant dense<0.000000e+00> : vector<16xf32>
    %288 = vector.multi_reduction <add>, %287, %cst_93 [1] : vector<16x32xf32> to vector<16xf32>
    %289 = vector.shape_cast %288 : vector<16xf32> to vector<16x1xf32>
    %cst_94 = arith.constant 3.200000e+01 : f32
    %290 = vector.broadcast %cst_94 : f32 to vector<16x1xf32>
    %291 = arith.divf %289, %290 : vector<16x1xf32>
    %292 = vector.broadcast %284 : vector<16x1xf32> to vector<16x32xf32>
    %293 = arith.subf %277, %292 : vector<16x32xf32>
    %cst_95 = arith.constant 9.99999974E-6 : f32
    %294 = vector.broadcast %cst_95 : f32 to vector<16x1xf32>
    %295 = arith.addf %291, %294 : vector<16x1xf32>
    %296 = math.rsqrt %295 : vector<16x1xf32>
    %297 = vector.broadcast %296 : vector<16x1xf32> to vector<16x32xf32>
    %298 = arith.mulf %293, %297 : vector<16x32xf32>
    %299 = vector.broadcast %279 : vector<1x32xf32> to vector<16x32xf32>
    %300 = arith.mulf %298, %299 : vector<16x32xf32>
    %301 = vector.broadcast %280 : vector<1x32xf32> to vector<16x32xf32>
    %302 = arith.addf %300, %301 : vector<16x32xf32>
    %c0_96 = arith.constant 0 : index
    %c0_97 = arith.constant 0 : index
    %303 = vector.load %arg10[%c0_96, %c0_97] : memref<32x128xf32, #tpu.memory_space<vmem>>, vector<32x128xf32>
    %cst_98 = arith.constant dense<0.000000e+00> : vector<16x128xf32>
    %304 = tpu.matmul %302, %303, %cst_98 {dimension_numbers = #tpu.dot_dimension_numbers<[1], [0], [0], [1], [0, 0, 1, 1], [], []>} : vector<16x32xf32>, vector<32x128xf32>, vector<16x128xf32> -> vector<16x128xf32>
    %c0_99 = arith.constant 0 : index
    %c0_100 = arith.constant 0 : index
    %305 = vector.load %arg11[%c0_99, %c0_100] : memref<1x128xf32, #tpu.memory_space<vmem>>, vector<1x128xf32>
    %306 = vector.broadcast %305 : vector<1x128xf32> to vector<16x128xf32>
    %307 = arith.addf %304, %306 : vector<16x128xf32>
    %c0_101 = arith.constant 0 : index
    %c0_102 = arith.constant 0 : index
    %308 = vector.load %arg12[%c0_101, %c0_102] : memref<16x128xf32, #tpu.memory_space<vmem>>, vector<16x128xf32>
    tpu.vector_store %arg12[%c0_101, %c0_102], %307 {strides = array<i32>} : memref<16x128xf32, #tpu.memory_space<vmem>>, vector<16x128xf32>,
    return
  }
}

</mosaic_0001>

<bundles_post_ra>
// kernel: gpt_forward.1
= control target key start
LH: loop header
LB: loop body
LE: loop exit
PB: predicated region body
PF: predicated region fallthrough
CT: control target
= control target key end

     0   :  { %v43_v0 = vlaneseq  ;;  %v5285_v1 = vmov 0   ;;  %vm71_vm0 = vcmask 64512   ;;  %v5286_v12 = vmov 0.0   ;;  %s5288_s14 = smov 120   ;;  %s5289_s15 = smov 112   ;;  %s6111_s0 = inlined_call_operand.vmem [shape: s32[16,1], index: 0, kind: input, shape index: {}]   ;;  %s6112_s2 = inlined_call_operand.vmem [shape: f32[8,32], index: 2, kind: input, shape index: {}]   ;;  %s6113_s1 = inlined_call_operand.vmem [shape: f32[64,32], index: 1, kind: input, shape index: {}]   ;;  %s6114_s4 = inlined_call_operand.vmem [shape: f32[2,32,96], index: 4, kind: input, shape index: {}]   ;;  %s6115_s3 = inlined_call_operand.vmem [shape: f32[2,4,32], index: 3, kind: input, shape index: {}]   ;;  %s6116_s5 = inlined_call_operand.vmem [shape: f32[2,32,32], index: 5, kind: input, shape index: {}]   ;;  %s6117_s6 = inlined_call_operand.vmem [shape: f32[2,3,128], index: 6, kind: input, shape index: {}]   ;;  %s6118_s7 = inlined_call_operand.vmem [shape: f32[2,32,128], index: 7, kind: input, shape index: {}]   ;;  %s6119_s8 = inlined_call_operand.vmem [shape: f32[2,128,32], index: 8, kind: input, shape index: {}]   ;;  %s6120_s10 = inlined_call_operand.vmem [shape: f32[32,128], index: 10, kind: input, shape index: {}]   ;;  %s6121_s9 = inlined_call_operand.vmem [shape: f32[2,32], index: 9, kind: input, shape index: {}]   ;;  %s6122_s11 = inlined_call_operand.vmem [shape: f32[1,128], index: 11, kind: input, shape index: {}]   ;;  %s6123_s12 = inlined_call_operand.vmem [shape: f32[16,128], index: 12, kind: output, shape index: {}]  }
   0x1   :  { %5200 = vset.pattern.permute.xlu0 %v5285_v1  ;;  %v41_v2 = vld [vmem:[%s6111_s0] sm:$0xff]  ;;  %v58_v7 = vld [vmem:[%s6113_s1 + $0x8] sm:$0xff]  ;;  %v59_v8 = vld [vmem:[%s6113_s1 + $0x10] sm:$0xff]  ;;  %vm150_vm2 = vcmask 523264   ;;  %vm236_vm5 = vcmask 261120   ;;  %vm5290_vm6 = vmmov 0  }
   0x2   :  { %v70_v3 = vld [vmem:[%s6112_s2] sm:$0xff]  ;;  %46 = vperm.xlu0 %5200, %v41_v2   ;;  %v5365_v4 = vand.u32 127, %v43_v0  ;;  %v5367_v5 = vshrl.u32 %v43_v0, 7  ;;  %v42_v9 = vld [vmem:[%s6111_s0 + $0x8] sm:$0xff]  ;;  %v60_v11 = vld [vmem:[%s6113_s1 + $0x18] sm:$0xff]  ;;  %s5287_s2 = smov 104  }
   0x3   :  { %4708 = vmatprep.subr.mxu0 %v70_v3  ;;  %v57_v6 = vld [vmem:[%s6113_s1] sm:$0xff]  ;;  %v5061_v14 = vpack.c.bf16 %v60_v11, %v59_v8  ;;  %v62_v16 = vld [vmem:[%s6113_s1 + $0x28] sm:$0xff]  ;;  %v63_v18 = vld [vmem:[%s6113_s1 + $0x30] sm:$0xff]  ;;  %s5291_s16 = smov 96   ;;  %s5292_s0 = smov 64  }
   0x4   :  { %4709 = vmatpush3.msra.mxu0 %v70_v3  ;;  %v5057_v10 = vpack.c.bf16 %v58_v7, %v57_v6  ;;  %vm67_vm1 = vcmp.eq.s32.totalorder %v5367_v5, %v5365_v4  ;;  %v61_v15 = vld [vmem:[%s6113_s1 + $0x20] sm:$0xff]  ;;  %v64_v19 = vld [vmem:[%s6113_s1 + $0x38] sm:$0xff]  ;;  %v277_v40 = vld [vmem:[%s6114_s4 + $0x8] sm:$0xff]  ;;  %v5432_v51 = vsub.s32 0, %v5367_v5  ;;  %v5440_v53 = vsub.s32 1, %v5367_v5 }
   0x5   :  { %v4431_v13 = vsel %vm67_vm1, 1.0, %v5286_v12  ;;  %v5065_v17 = vpack.c.bf16 %v62_v16, %v61_v15  ;;  %v5069_v20 = vpack.c.bf16 %v64_v19, %v63_v18  ;;  %v276_v39 = vld [vmem:[%s6114_s4] sm:$0xff]  ;;  %v278_v41 = vld [vmem:[%s6114_s4 + $0x10] sm:$0xff]  ;;  %v279_v43 = vld [vmem:[%s6114_s4 + $0x18] sm:$0xff]  ;;  %vm232_vm7 = vcmp.le.s32.totalorder %v5365_v4, %v5367_v5 }
   0x6   :  { %5058 = vmatprep.subr.bf16.mxu0 %v5057_v10  ;;  %49 = vperm.xlu0 %5200, %v42_v9   ;;  %v5073_v42 = vpack.c.bf16 %v277_v40, %v276_v39  ;;  %v5077_v44 = vpack.c.bf16 %v279_v43, %v278_v41  ;;  %v5437_v52 = vld [vmem:[%s6115_s3] sm:$0xf] }
   0x7   :  { %4710 = vmatprep.mubr.msk.f32.mxu0 %vm71_vm0, %v4431_v13  ;;  %v267_v54 = vrot.slane %v5437_v52, %v5432_v51  ;;  %v273_v57 = vrot.slane %v5437_v52, %v5440_v53 }
   0x8   :  { %4711 = vmatmul.mubr.msk.f32.vlgmr.msra.gmra.mrb[0].mxu0 %vm71_vm0, %v4431_v13  ;;  %5074 = vmatprep.subr.bf16.mxu1 %v5073_v42 }
   0x9   :  { %5060 = vmatpush3.bf16.msra.mxu0 %v5057_v10  ;;  %5076 = vmatpush3.bf16.msra.mxu1 %v5073_v42 }
   0xa   :  { %5062 = vmatprep.subr.bf16.mxu0 %v5061_v14  ;;  %5078 = vmatprep.subr.bf16.mxu1 %v5077_v44 }
   0xd   :  { %5064 = vmatpush3.bf16.msra.mxu0 %v5061_v14  ;;  %5080 = vmatpush3.bf16.msra.mxu1 %v5077_v44 }
   0xe   :  { %5066 = vmatprep.subr.bf16.mxu0 %v5065_v17  ;;  %4743 = vmatprep.subr.mxu1 %v5286_v12 }
  0x11   :  { %5068 = vmatpush3.bf16.msra.mxu0 %v5065_v17 }
  0x12   :  { %5070 = vmatprep.subr.bf16.mxu0 %v5069_v20 }
  0x15   :  { %5072 = vmatpush3.bf16.msra.mxu0 %v5069_v20  ;;  %v5293_v20 = vmov -1e+30  }
  0x16   :  { %4758 = vmatprep.subr.mxu0 %v5286_v12 }
  0x81   :  { %v47_v21 = vpop.permute.xlu0 %46 }
  0x82   :  { %vm51_vm3 = vcmp.eq.s32.totalorder %v47_v21, %v5365_v4  ;;  %v5541_v21 = vsel %vm232_vm7, 0.0, %v5293_v20 }
  0x83   :  { %v4429_v22 = vsel %vm51_vm3, 1.0, %v5286_v12 }
  0x84   :  { %4729 = vmatprep.mubr.msk.f32.mxu0 %vm150_vm2, %v4429_v22 }
  0x85   :  { %v50_v23 = vpop.permute.xlu0 %49 }
  0x86   :  { %vm52_vm4 = vcmp.eq.s32.totalorder %v50_v23, %v5365_v4 }
  0x87   :  { %v4430_v24 = vsel %vm52_vm4, 1.0, %v5286_v12 }
  0x88   :  { %4730 = vmatmul.mubr.msk.f32.vlgmr.msra.gmra.mrb[0].mxu0 %vm150_vm2, %v4430_v24 }
  0x89   :  { %4760 = vmatprep.mubr.msk.f32.mxu0 %vm5290_vm6, %v5286_v12 }
 0x15b   :  { %v5406_v25 = vpop.f32.mrb[0].mxu0 }
 0x15c   :  { %v5408_v26 = vpop.f32.mrb[1].mxu0  ;;  %v240_v28 = vsel %vm236_vm5, %v5406_v25, 0.0 }
 0x15d   :  { %v237_v27 = vsel %vm236_vm5, %v5408_v26, 0.0 }
 0x15e   :  { %238 = vadd.xlane.f32.xlu1 %v237_v27 }
 0x162   :  { %241 = vadd.xlane.f32.xlu1 %v240_v28 }
 0x1eb   :  { %v239_v29 = vpop.xlane.xlu1 %238 }
 0x1ec   :  { %v244_v30 = vmul.f32 0.03125, %v239_v29 }
 0x1ee   :  { %v246_v31 = vsub.f32 %v5408_v26, %v244_v30 }
 0x1ef   :  { %v242_v32 = vpop.xlane.xlu1 %241 }
 0x1f0   :  { %v245_v33 = vmul.f32 0.03125, %v242_v32  ;;  %v248_v34 = vmul.f32 %v246_v31, %v246_v31 }
 0x1f2   :  { %v247_v35 = vsub.f32 %v5406_v25, %v245_v33  ;;  %v250_v36 = vsel %vm236_vm5, %v248_v34, 0.0 }
 0x1f3   :  { %251 = vadd.xlane.f32.xlu0 %v250_v36 }
 0x1f4   :  { %v249_v37 = vmul.f32 %v247_v35, %v247_v35 }
 0x1f6   :  { %v253_v38 = vsel %vm236_vm5, %v249_v37, 0.0 }
 0x1f7   :  { %254 = vadd.xlane.f32.xlu1 %v253_v38 }
 0x280   :  { %v252_v45 = vpop.xlane.xlu0 %251 }
 0x281   :  { %v256_v46 = vmul.f32 0.03125, %v252_v45 }
 0x283   :  { %v258_v47 = vadd.f32 1e-05, %v256_v46 }
 0x284   :  { %v255_v48 = vpop.xlane.xlu1 %254 }
 0x285   :  { %5201 = vrsqrt.f32 %v258_v47  ;;  %v257_v49 = vmul.f32 0.03125, %v255_v48 }
 0x287   :  { %v259_v50 = vadd.f32 1e-05, %v257_v49 }
 0x289   :  { %5203 = vrsqrt.f32 %v259_v50 }
 0x28f   :  { %v5202_v55 = vpop.eup %5201 }
 0x290   :  { %v262_v56 = vmul.f32 %v5202_v55, %v246_v31 }
 0x292   :  { %v268_v58 = vmul.f32 %v267_v54, %v262_v56 }
 0x293   :  { %v5204_v59 = vpop.eup %5203 }
 0x294   :  { %v263_v60 = vmul.f32 %v5204_v59, %v247_v35  ;;  %v274_v61 = vadd.f32 %v273_v57, %v268_v58 }
 0x296   :  { %v269_v62 = vmul.f32 %v267_v54, %v263_v60  ;;  %4740 = vmatprep.mubr.msk.f32.mxu1 %vm236_vm5, %v274_v61 }
 0x298   :  { %v275_v63 = vadd.f32 %v273_v57, %v269_v62 }
 0x29a   :  { %4741 = vmatmul.mubr.msk.f32.vlgmr.msra.gmra.mrb[0].mxu1 %vm236_vm5, %v275_v63 }
 0x29b   :  { %4745 = vmatprep.mubr.msk.f32.mxu1 %vm5290_vm6, %v5286_v12 }
 0x36d   :  { %v5448_v0 = vpop.f32.mrb[0].mxu1 }
 0x36e   :  { %v352_v1 = vpop.f32.mrb[1].mxu1 }
 0x36f   :  { %371 = vrot.lane.b32.xlu0 %v352_v1, %s5287_s2  ;;  %363 = vrot.lane.b32.xlu1 %v352_v1, %s5288_s14 }
 0x373   :  { %365 = vrot.lane.b32.xlu1 %v5448_v0, %s5288_s14 }
 0x377   :  { %367 = vrot.lane.b32.xlu1 %v352_v1, %s5289_s15 }
 0x37b   :  { %369 = vrot.lane.b32.xlu1 %v5448_v0, %s5289_s15 }
 0x37f   :  { %373 = vrot.lane.b32.xlu1 %v5448_v0, %s5287_s2 }
 0x383   :  { %375 = vrot.lane.b32.xlu1 %v352_v1, %s5291_s16 }
 0x387   :  { %451 = vrot.lane.b32.xlu1 %v5448_v0, %s5291_s16 }
 0x3e1   :  { %v5466_v2 = vpop.permute.xlu1 %363  ;;  %v5478_v7 = vpop.permute.xlu0 %371 }
 0x3e2   :  { %527 = vrot.lane.b32.xlu1 %v5466_v2, %s5291_s16 }
 0x3e5   :  { %v5470_v3 = vpop.permute.xlu1 %365 }
 0x3e6   :  { %603 = vrot.lane.b32.xlu1 %v5470_v3, %s5291_s16 }
 0x3e9   :  { %v5474_v6 = vpop.permute.xlu1 %367 }
 0x3ea   :  { %679 = vrot.lane.b32.xlu0 %v5474_v6, %s5291_s16 }
 0x3ed   :  { %v5480_v8 = vpop.permute.xlu1 %369 }
 0x3ee   :  { %831 = vrot.lane.b32.xlu0 %v5478_v7, %s5291_s16  ;;  %755 = vrot.lane.b32.xlu1 %v5480_v8, %s5291_s16 }
 0x3f1   :  { %v5486_v9 = vpop.permute.xlu1 %373 }
 0x3f2   :  { %907 = vrot.lane.b32.xlu1 %v5486_v9, %s5291_s16 }
 0x3f5   :  { %v376_v10 = vpop.permute.xlu1 %375 }
 0x3f6   :  { %1087 = vrot.lane.b32.xlu1 %v352_v1, %s5292_s0  ;;  %4744 = vmatpush3.xpose.msk.msra.mxu1 %vm71_vm0, %v376_v10 }
 0x3f7   :  { %4748 = vmatprep.subr.mxu1 %v5286_v12 }
 0x3f9   :  { %4746 = vmatmul.mubr.msk.f32.vlgmr.msra.gmra.mrb[2].mxu1 %vm71_vm0, %v352_v1  ;;  %v452_v11 = vpop.permute.xlu1 %451 }
 0x3fa   :  { %4749 = vmatpush3.xpose.msk.msra.mxu1 %vm71_vm0, %v452_v11  ;;  %4750 = vmatprep.mubr.msk.f32.mxu1 %vm5290_vm6, %v5286_v12 }
 0x3fb   :  { %4753 = vmatprep.subr.mxu1 %v5286_v12 }
 0x3fd   :  { %4751 = vmatmul.mubr.msk.f32.vlgmr.msra.gmra.mrb[4].mxu1 %vm71_vm0, %v5448_v0 }
 0x3fe   :  { %4755 = vmatprep.mubr.msk.f32.mxu1 %vm5290_vm6, %v5286_v12 }
 0x454   :  { %v528_v13 = vpop.permute.xlu1 %527 }
 0x455   :  { %4754 = vmatpush3.xpose.msk.msra.mxu1 %vm71_vm0, %v528_v13 }
 0x456   :  { %4763 = vmatprep.subr.mxu1 %v5286_v12 }
 0x458   :  { %4756 = vmatmul.mubr.msk.f32.vlgmr.msra.gmra.mrb[6].mxu1 %vm71_vm0, %v5466_v2  ;;  %v604_v14 = vpop.permute.xlu1 %603 }
 0x459   :  { %4759 = vmatpush3.xpose.msk.msra.mxu0 %vm71_vm0, %v604_v14  ;;  %4765 = vmatprep.mubr.msk.f32.mxu1 %vm5290_vm6, %v5286_v12 }
 0x45a   :  { %4768 = vmatprep.subr.mxu0 %v5286_v12 }
 0x45c   :  { %v680_v15 = vpop.permute.xlu0 %679  ;;  %4761 = vmatmul.mubr.msk.f32.vlgmr.msra.gmra.mrb[2].mxu0 %vm71_vm0, %v5470_v3 }
 0x45d   :  { %4764 = vmatpush3.xpose.msk.msra.mxu1 %vm71_vm0, %v680_v15  ;;  %4770 = vmatprep.mubr.msk.f32.mxu0 %vm5290_vm6, %v5286_v12 }
 0x45e   :  { %4773 = vmatprep.subr.mxu1 %v5286_v12 }
 0x460   :  { %v832_v16 = vpop.permute.xlu0 %831  ;;  %4766 = vmatmul.mubr.msk.f32.vlgmr.msra.gmra.mrb[8].mxu1 %vm71_vm0, %v5474_v6  ;;  %v756_v17 = vpop.permute.xlu1 %755 }
 0x461   :  { %4769 = vmatpush3.xpose.msk.msra.mxu0 %vm71_vm0, %v756_v17  ;;  %4774 = vmatpush3.xpose.msk.msra.mxu1 %vm71_vm0, %v832_v16 }
 0x462   :  { %4775 = vmatprep.mubr.msk.f32.mxu1 %vm5290_vm6, %v5286_v12  ;;  %4778 = vmatprep.subr.mxu0 %v5286_v12 }
 0x463   :  { %4783 = vmatprep.subr.mxu1 %v5286_v12 }
 0x464   :  { %4771 = vmatmul.mubr.msk.f32.vlgmr.msra.gmra.mrb[4].mxu0 %vm71_vm0, %v5480_v8  ;;  %4776 = vmatmul.mubr.msk.f32.vlgmr.msra.gmra.mrb[10].mxu1 %vm71_vm0, %v5478_v7  ;;  %v908_v18 = vpop.permute.xlu1 %907 }
 0x465   :  { %4779 = vmatpush3.xpose.msk.msra.mxu0 %vm71_vm0, %v908_v18  ;;  %4780 = vmatprep.mubr.msk.f32.mxu0 %vm5290_vm6, %v5286_v12 }
 0x466   :  { %4788 = vmatprep.subr.mxu0 %v5286_v12  ;;  %4785 = vmatprep.mubr.msk.f32.mxu1 %vm5290_vm6, %v5286_v12 }
 0x468   :  { %4781 = vmatmul.mubr.msk.f32.vlgmr.msra.gmra.mrb[6].mxu0 %vm71_vm0, %v5486_v9  ;;  %v1088_v19 = vpop.permute.xlu1 %1087 }
 0x469   :  { %4784 = vmatpush3.msra.mxu1 %v1088_v19  ;;  %4790 = vmatprep.mubr.msk.f32.mxu0 %vm5290_vm6, %v5286_v12 }
 0x46a   :  { %4793 = vmatprep.subr.mxu1 %v5286_v12 }
 0x4cc   :  { %v447_v22 = vpop.f32.mrb[2].mxu1 }
 0x4cd   :  { %v983_v23 = vmul.f32 0.17677669, %v447_v22  ;;  %v4747_v24 = vpop.f32.mrb[3].mxu1 }
 0x4cf   :  { %v991_v27 = vadd.f32 %v983_v23, %v5541_v21 }
 0x4d0   :  { %v523_v28 = vpop.f32.mrb[4].mxu1 }
 0x4d1   :  { %v984_v29 = vmul.f32 0.17677669, %v523_v28  ;;  %v4752_v30 = vpop.f32.mrb[5].mxu1  ;;  %v999_v31 = vsel %vm71_vm0, %v991_v27, -inf }
 0x4d2   :  { %1000 = vmax.xlane.f32.xlu0 %v999_v31 }
 0x4d3   :  { %v992_v32 = vadd.f32 %v984_v29, %v5541_v21 }
 0x4d5   :  { %v1002_v33 = vsel %vm71_vm0, %v992_v32, -inf }
 0x4d6   :  { %1003 = vmax.xlane.f32.xlu1 %v1002_v33 }
 0x52b   :  { %v599_v4 = vpop.f32.mrb[6].mxu1 }
 0x52c   :  { %v4757_v34 = vpop.f32.mrb[7].mxu1  ;;  %v985_v36 = vmul.f32 0.17677669, %v599_v4 }
 0x52e   :  { %v993_v44 = vadd.f32 %v985_v36, %v5541_v21 }
 0x52f   :  { %v675_v35 = vpop.f32.mrb[2].mxu0 }
 0x530   :  { %v986_v37 = vmul.f32 0.17677669, %v675_v35  ;;  %v4762_v38 = vpop.f32.mrb[3].mxu0  ;;  %v1005_v54 = vsel %vm71_vm0, %v993_v44, -inf }
 0x532   :  { %v994_v39 = vadd.f32 %v986_v37, %v5541_v21 }
 0x533   :  { %v751_v40 = vpop.f32.mrb[8].mxu1 }
 0x534   :  { %v987_v41 = vmul.f32 0.17677669, %v751_v40  ;;  %v4767_v42 = vpop.f32.mrb[9].mxu1  ;;  %v1008_v43 = vsel %vm71_vm0, %v994_v39, -inf }
 0x535   :  { %1009 = vmax.xlane.f32.xlu0 %v1008_v43 }
 0x536   :  { %v5551_v45 = vadd.f32 %v987_v41, %v5541_v21 }
 0x537   :  { %v827_v46 = vpop.f32.mrb[4].mxu0  ;;  %v903_v47 = vpop.f32.mrb[10].mxu1 }
 0x538   :  { %v988_v48 = vmul.f32 0.17677669, %v827_v46  ;;  %v4772_v49 = vpop.f32.mrb[5].mxu0  ;;  %v4777_v50 = vpop.f32.mrb[11].mxu1  ;;  %v1011_v55 = vsel %vm71_vm0, %v5551_v45, -inf }
 0x539   :  { %1006 = vmax.xlane.f32.xlu0 %v1005_v54  ;;  %1012 = vmax.xlane.f32.xlu1 %v1011_v55  ;;  %v989_v14 = vmul.f32 0.17677669, %v903_v47 }
 0x53a   :  { %v996_v56 = vadd.f32 %v988_v48, %v5541_v21 }
 0x53b   :  { %v979_v57 = vpop.f32.mrb[6].mxu0  ;;  %v997_v16 = vadd.f32 %v989_v14, %v5541_v21 }
 0x53c   :  { %v990_v58 = vmul.f32 0.17677669, %v979_v57  ;;  %v4782_v59 = vpop.f32.mrb[7].mxu0  ;;  %v1014_v60 = vsel %vm71_vm0, %v996_v56, -inf }
 0x53d   :  { %1015 = vmax.xlane.f32.xlu0 %v1014_v60  ;;  %v1017_v17 = vsel %vm71_vm0, %v997_v16, -inf }
 0x53e   :  { %v998_v61 = vadd.f32 %v990_v58, %v5541_v21 }
 0x540   :  { %v1020_v62 = vsel %vm71_vm0, %v998_v61, -inf }
 0x541   :  { %1021 = vmax.xlane.f32.xlu0 %v1020_v62 }
 0x54a   :  { %1239 = vrot.lane.b32.xlu1 %v5466_v2, %s5292_s0 }
 0x557   :  { %1163 = vrot.lane.b32.xlu0 %v5448_v0, %s5292_s0 }
 0x55f   :  { %v1001_v63 = vpop.xlane.xlu0 %1000 }
 0x560   :  { %v1023_v1 = vsub.f32 %v991_v27, %v1001_v63 }
 0x562   :  { %v1031_v10 = vmul.f32 1.442695, %v1023_v1 }
 0x563   :  { %v1004_v11 = vpop.xlane.xlu1 %1003 }
 0x564   :  { %v1024_v13 = vsub.f32 %v992_v32, %v1004_v11  ;;  %5205 = vpow2.f32 %v1031_v10 }
 0x566   :  { %v1033_v15 = vmul.f32 1.442695, %v1024_v13 }
 0x568   :  { %5207 = vpow2.f32 %v1033_v15 }
 0x56e   :  { %v5206_v18 = vpop.eup %5205  ;;  %1018 = vmax.xlane.f32.xlu1 %v1017_v17 }
 0x56f   :  { %v1047_v2 = vsel %vm71_vm0, %v5206_v18, 0.0 }
 0x572   :  { %v5208_v19 = vpop.eup %5207  ;;  %1048 = vadd.xlane.f32.xlu1 %v1047_v2 }
 0x573   :  { %v1050_v0 = vsel %vm71_vm0, %v5208_v19, 0.0 }
 0x576   :  { %1051 = vadd.xlane.f32.xlu0 %v1050_v0 }
 0x583   :  { %1391 = vrot.lane.b32.xlu1 %v5474_v6, %s5292_s0 }
 0x5c2   :  { %v1010_v20 = vpop.xlane.xlu0 %1009 }
 0x5c3   :  { %v1026_v22 = vsub.f32 %v994_v39, %v1010_v20 }
 0x5c5   :  { %v1037_v23 = vmul.f32 1.442695, %v1026_v22 }
 0x5c6   :  { %v1007_v24 = vpop.xlane.xlu0 %1006  ;;  %v1013_v34 = vpop.xlane.xlu1 %1012 }
 0x5c7   :  { %5209 = vpow2.f32 %v1037_v23  ;;  %v1025_v27 = vsub.f32 %v993_v44, %v1007_v24  ;;  %v1027_v36 = vsub.f32 %v5551_v45, %v1013_v34 }
 0x5c9   :  { %v1035_v28 = vmul.f32 1.442695, %v1025_v27  ;;  %v1039_v40 = vmul.f32 1.442695, %v1027_v36  ;;  %v1697_v36 = vld [vmem:[%s6116_s5 + $0x10] sm:$0xff] }
 0x5ca   :  { %v1016_v29 = vpop.xlane.xlu0 %1015  ;;  %v1240_v39 = vpop.permute.xlu1 %1239 }
 0x5cb   :  { %5211 = vpow2.f32 %v1035_v28  ;;  %v1028_v35 = vsub.f32 %v996_v56, %v1016_v29  ;;  %v1696_v28 = vld [vmem:[%s6116_s5 + $0x8] sm:$0xff]  ;;  %v1695_v29 = vld [vmem:[%s6116_s5] sm:$0xff] }
 0x5cd   :  { %v1041_v37 = vmul.f32 1.442695, %v1028_v35 }
 0x5ce   :  { %v1022_v30 = vpop.xlane.xlu0 %1021 }
 0x5cf   :  { %v1030_v38 = vsub.f32 %v998_v61, %v1022_v30  ;;  %5213 = vpow2.f32 %v1041_v37  ;;  %v1698_v37 = vld [vmem:[%s6116_s5 + $0x18] sm:$0xff] }
 0x5d0   :  { %5215 = vpow2.f32 %v1039_v40 }
 0x5d1   :  { %v5570_v31 = vpop.eup %5209  ;;  %v1045_v41 = vmul.f32 1.442695, %v1030_v38 }
 0x5d2   :  { %v1164_v32 = vpop.permute.xlu0 %1163  ;;  %v1056_v33 = vsel %vm71_vm0, %v5570_v31, 0.0 }
 0x5d3   :  { %4789 = vmatpush3.msra.mxu0 %v1164_v32  ;;  %1057 = vadd.xlane.f32.xlu0 %v1056_v33  ;;  %5217 = vpow2.f32 %v1045_v41 }
 0x5d4   :  { %4798 = vmatprep.subr.mxu0 %v5286_v12 }
 0x5d5   :  { %v5575_v6 = vpop.eup %5211 }
 0x5d6   :  { %v1053_v4 = vsel %vm71_vm0, %v5575_v6, 0.0 }
 0x5d7   :  { %1054 = vadd.xlane.f32.xlu1 %v1053_v4 }
 0x5e8   :  { %1467 = vrot.lane.b32.xlu1 %v5480_v8, %s5292_s0 }
 0x5e9   :  { %1315 = vrot.lane.b32.xlu0 %v5470_v3, %s5292_s0  ;;  %v5214_v3 = vpop.eup %5213 }
 0x5ea   :  { %v5216_v47 = vpop.eup %5215  ;;  %v1062_v45 = vsel %vm71_vm0, %v5214_v3, 0.0 }
 0x5eb   :  { %v5218_v48 = vpop.eup %5217  ;;  %v1059_v54 = vsel %vm71_vm0, %v5216_v47, 0.0 }
 0x5ec   :  { %v1068_v50 = vsel %vm71_vm0, %v5218_v48, 0.0 }
 0x5fb   :  { %v1019_v42 = vpop.xlane.xlu1 %1018 }
 0x5fc   :  { %v1029_v43 = vsub.f32 %v997_v16, %v1019_v42 }
 0x5fe   :  { %v1043_v44 = vmul.f32 1.442695, %v1029_v43 }
 0x5ff   :  { %v1049_v46 = vpop.xlane.xlu1 %1048 }
 0x600   :  { %5219 = vpow2.f32 %v1043_v44 }
 0x601   :  { %5221 = vrcp.f32 %v1049_v46 }
 0x603   :  { %v1052_v8 = vpop.xlane.xlu0 %1051  ;;  %v1392_v60 = vpop.permute.xlu1 %1391 }
 0x604   :  { %5223 = vrcp.f32 %v1052_v8  ;;  %v5641_v8 = vld [vmem:[%s6117_s6] sm:$0x7] }
 0x608   :  { %1063 = vadd.xlane.f32.xlu0 %v1062_v45 }
 0x60a   :  { %v5220_v49 = vpop.eup %5219 }
 0x60b   :  { %v5222_v55 = vpop.eup %5221  ;;  %v1065_v59 = vsel %vm71_vm0, %v5220_v49, 0.0 }
 0x60c   :  { %1069 = vadd.xlane.f32.xlu0 %v1068_v50  ;;  %1060 = vadd.xlane.f32.xlu1 %v1059_v54  ;;  %v1079_v56 = vmul.f32 %v5222_v55, %v5206_v18 }
 0x60e   :  { %v5224_v57 = vpop.eup %5223  ;;  %4786 = vmatmul.mubr.msk.f32.vlgmr.msra.gmra.mrb[12].mxu1 %vm71_vm0, %v1079_v56 }
 0x60f   :  { %v1080_v58 = vmul.f32 %v5224_v57, %v5208_v19  ;;  %4794 = vmatpush3.msra.mxu1 %v1240_v39  ;;  %4795 = vmatprep.mubr.msk.f32.mxu1 %vm5290_vm6, %v5286_v12 }
 0x610   :  { %1066 = vadd.xlane.f32.xlu1 %v1065_v59  ;;  %4803 = vmatprep.subr.mxu1 %v5286_v12 }
 0x611   :  { %4791 = vmatmul.mubr.msk.f32.vlgmr.msra.gmra.mrb[8].mxu0 %vm71_vm0, %v1080_v58 }
 0x612   :  { %4800 = vmatprep.mubr.msk.f32.mxu0 %vm5290_vm6, %v5286_v12 }
 0x621   :  { %1619 = vrot.lane.b32.xlu1 %v5486_v9, %s5292_s0 }
 0x622   :  { %1543 = vrot.lane.b32.xlu0 %v5478_v7, %s5292_s0 }
 0x660   :  { %v1058_v61 = vpop.xlane.xlu0 %1057 }
 0x661   :  { %5225 = vrcp.f32 %v1058_v61 }
 0x664   :  { %v1316_v62 = vpop.permute.xlu0 %1315  ;;  %v1055_v63 = vpop.xlane.xlu1 %1054 }
 0x665   :  { %5227 = vrcp.f32 %v1055_v63  ;;  %4799 = vmatpush3.msra.mxu0 %v1316_v62 }
 0x666   :  { %4808 = vmatprep.subr.mxu0 %v5286_v12 }
 0x668   :  { %v1468_v11 = vpop.permute.xlu1 %1467 }
 0x66b   :  { %v5226_v1 = vpop.eup %5225 }
 0x66c   :  { %v1082_v10 = vmul.f32 %v5226_v1, %v5570_v31 }
 0x66e   :  { %4801 = vmatmul.mubr.msk.f32.vlgmr.msra.gmra.mrb[10].mxu0 %vm71_vm0, %v1082_v10  ;;  %v2073_v10 = vld [vmem:[%s6118_s7] sm:$0xff] }
 0x66f   :  { %v5228_v13 = vpop.eup %5227  ;;  %4809 = vmatpush3.msra.mxu0 %v1468_v11  ;;  %4810 = vmatprep.mubr.msk.f32.mxu0 %vm5290_vm6, %v5286_v12  ;;  %v2074_v11 = vld [vmem:[%s6118_s7 + $0x8] sm:$0xff] }
 0x670   :  { %v1081_v7 = vmul.f32 %v5228_v13, %v5575_v6  ;;  %4818 = vmatprep.subr.mxu0 %v5286_v12  ;;  %v5081_v13 = vpack.c.bf16 %v2074_v11, %v2073_v10 }
 0x672   :  { %4796 = vmatmul.mubr.msk.f32.vlgmr.msra.gmra.mrb[14].mxu1 %vm71_vm0, %v1081_v7  ;;  %v2075_v7 = vld [vmem:[%s6118_s7 + $0x10] sm:$0xff] }
 0x673   :  { %4804 = vmatpush3.msra.mxu1 %v1392_v60  ;;  %4805 = vmatprep.mubr.msk.f32.mxu1 %vm5290_vm6, %v5286_v12 }
 0x674   :  { %4813 = vmatprep.subr.mxu1 %v5286_v12 }
 0x695   :  { %v1064_v9 = vpop.xlane.xlu0 %1063 }
 0x696   :  { %5229 = vrcp.f32 %v1064_v9  ;;  %v2076_v9 = vld [vmem:[%s6118_s7 + $0x18] sm:$0xff] }
 0x699   :  { %v1070_v14 = vpop.xlane.xlu0 %1069  ;;  %v1061_v15 = vpop.xlane.xlu1 %1060 }
 0x69a   :  { %5231 = vrcp.f32 %v1070_v14  ;;  %v5085_v14 = vpack.c.bf16 %v2076_v9, %v2075_v7 }
 0x69b   :  { %5233 = vrcp.f32 %v1061_v15  ;;  %v2164_v15 = vld [vmem:[%s6119_s8] sm:$0xff] }
 0x69d   :  { %v1067_v16 = vpop.xlane.xlu1 %1066  ;;  %v1544_v24 = vpop.permute.xlu0 %1543 }
 0x69e   :  { %5235 = vrcp.f32 %v1067_v16  ;;  %v2165_v16 = vld [vmem:[%s6119_s8 + $0x8] sm:$0xff] }
 0x6a0   :  { %v5230_v17 = vpop.eup %5229 }
 0x6a1   :  { %v1084_v18 = vmul.f32 %v5230_v17, %v5214_v3  ;;  %v1620_v19 = vpop.permute.xlu1 %1619  ;;  %v2032_v3 = vrot.slane %v5641_v8, %v5432_v51  ;;  %v2166_v17 = vld [vmem:[%s6119_s8 + $0x10] sm:$0xff] }
 0x6a3   :  { %4811 = vmatmul.mubr.msk.f32.vlgmr.msra.gmra.mrb[12].mxu0 %vm71_vm0, %v1084_v18  ;;  %v5089_v18 = vpack.c.bf16 %v2165_v16, %v2164_v15 }
 0x6a4   :  { %v5232_v2 = vpop.eup %5231  ;;  %4819 = vmatpush3.msra.mxu0 %v1620_v19  ;;  %4820 = vmatprep.mubr.msk.f32.mxu0 %vm5290_vm6, %v5286_v12  ;;  %v2167_v19 = vld [vmem:[%s6119_s8 + $0x18] sm:$0xff] }
 0x6a5   :  { %v5234_v0 = vpop.eup %5233  ;;  %v1086_v20 = vmul.f32 %v5232_v2, %v5218_v48  ;;  %v5093_v2 = vpack.c.bf16 %v2167_v19, %v2166_v17  ;;  %5090 = vmatprep.subr.bf16.mxu0 %v5089_v18 }
 0x6a6   :  { %v1083_v22 = vmul.f32 %v5234_v0, %v5216_v47  ;;  %v2168_v0 = vld [vmem:[%s6119_s8 + $0x20] sm:$0xff] }
 0x6a7   :  { %4821 = vmatmul.mubr.msk.f32.vlgmr.msra.gmra.mrb[14].mxu0 %vm71_vm0, %v1086_v20  ;;  %v2169_v20 = vld [vmem:[%s6119_s8 + $0x28] sm:$0xff] }
 0x6a8   :  { %v5236_v23 = vpop.eup %5235  ;;  %4806 = vmatmul.mubr.msk.f32.vlgmr.msra.gmra.mrb[16].mxu1 %vm71_vm0, %v1083_v22  ;;  %5092 = vmatpush3.bf16.msra.mxu0 %v5089_v18  ;;  %v5097_v22 = vpack.c.bf16 %v2169_v20, %v2168_v0 }
 0x6a9   :  { %v1085_v27 = vmul.f32 %v5236_v23, %v5220_v49  ;;  %4814 = vmatpush3.msra.mxu1 %v1544_v24  ;;  %4815 = vmatprep.mubr.msk.f32.mxu1 %vm5290_vm6, %v5286_v12  ;;  %v2170_v23 = vld [vmem:[%s6119_s8 + $0x30] sm:$0xff]  ;;  %v2171_v24 = vld [vmem:[%s6119_s8 + $0x38] sm:$0xff] }
 0x6aa   :  { %4823 = vmatprep.subr.mxu1 %v1696_v28  ;;  %5094 = vmatprep.subr.bf16.mxu0 %v5093_v2 }
 0x6ac   :  { %4816 = vmatmul.mubr.msk.f32.vlgmr.msra.gmra.mrb[18].mxu1 %vm71_vm0, %v1085_v27  ;;  %5096 = vmatpush3.bf16.msra.mxu0 %v5093_v2  ;;  %v5101_v27 = vpack.c.bf16 %v2171_v24, %v2170_v23  ;;  %v4474_v23 = vld [vmem:[%s6114_s4 + $0x20] sm:$0xff]  ;;  %v4475_v24 = vld [vmem:[%s6114_s4 + $0x28] sm:$0xff] }
 0x6ad   :  { %4824 = vmatpush3.msra.mxu1 %v1696_v28  ;;  %5098 = vmatprep.subr.bf16.mxu0 %v5097_v22  ;;  %v2172_v28 = vld [vmem:[%s6119_s8 + $0x40] sm:$0xff] }
 0x6ae   :  { %4828 = vmatprep.subr.mxu1 %v1695_v29 }
 0x6b0   :  { %5100 = vmatpush3.bf16.msra.mxu0 %v5097_v22 }
 0x6b1   :  { %5102 = vmatprep.subr.bf16.mxu0 %v5101_v27 }
 0x6b4   :  { %5104 = vmatpush3.bf16.msra.mxu0 %v5101_v27  ;;  %v5121_v27 = vpack.c.bf16 %v4475_v24, %v4474_v23 }
 0x6e1   :  { %v1159_v30 = vpop.f32.mrb[12].mxu1 }
 0x6e2   :  { %v4787_v31 = vpop.f32.mrb[13].mxu1 }
 0x6e3   :  { %v2174_v31 = vld [vmem:[%s6119_s8 + $0x50] sm:$0xff] }
 0x6e4   :  { %v1235_v32 = vpop.f32.mrb[8].mxu0 }
 0x6e5   :  { %v4792_v33 = vpop.f32.mrb[9].mxu0 }
 0x741   :  { %v1387_v6 = vpop.f32.mrb[10].mxu0 }
 0x742   :  { %v4802_v4 = vpop.f32.mrb[11].mxu0 }
 0x743   :  { %v2177_v4 = vld [vmem:[%s6119_s8 + $0x68] sm:$0xff] }
 0x745   :  { %v1311_v34 = vpop.f32.mrb[14].mxu1 }
 0x746   :  { %v4797_v35 = vpop.f32.mrb[15].mxu1  ;;  %4825 = vmatprep.mubr.msk.f32.mxu1 %vm71_vm0, %v1311_v34 }
 0x747   :  { %4826 = vmatmul.mubr.msk.f32.vlgmr.msra.gmra.mrb[20].mxu1 %vm71_vm0, %v1387_v6  ;;  %v2176_v6 = vld [vmem:[%s6119_s8 + $0x60] sm:$0xff] }
 0x748   :  { %4830 = vmatprep.mubr.msk.f32.mxu1 %vm71_vm0, %v1159_v30  ;;  %4829 = vmatpush3.msra.mxu1 %v1695_v29  ;;  %v2173_v29 = vld [vmem:[%s6119_s8 + $0x48] sm:$0xff]  ;;  %v5113_v34 = vpack.c.bf16 %v2177_v4, %v2176_v6 }
 0x749   :  { %4833 = vmatprep.subr.mxu1 %v1697_v36  ;;  %v5105_v30 = vpack.c.bf16 %v2173_v29, %v2172_v28  ;;  %v4476_v28 = vld [vmem:[%s6114_s4 + $0x30] sm:$0xff]  ;;  %v4477_v29 = vld [vmem:[%s6114_s4 + $0x38] sm:$0xff] }
 0x74b   :  { %5106 = vmatprep.subr.bf16.mxu0 %v5105_v30 }
 0x74c   :  { %5108 = vmatpush3.bf16.msra.mxu0 %v5105_v30  ;;  %v5125_v30 = vpack.c.bf16 %v4477_v29, %v4476_v28 }
 0x74f   :  { %4831 = vmatmul.mubr.msk.f32.vlgmr.msra.gmra.mrb[20].mxu1 %vm71_vm0, %v1235_v32  ;;  %v2175_v32 = vld [vmem:[%s6119_s8 + $0x58] sm:$0xff] }
 0x750   :  { %4834 = vmatpush3.msra.mxu1 %v1697_v36  ;;  %v5109_v33 = vpack.c.bf16 %v2175_v32, %v2174_v31 }
 0x751   :  { %4838 = vmatprep.subr.mxu1 %v1698_v37 }
 0x752   :  { %5110 = vmatprep.subr.bf16.mxu0 %v5109_v33 }
 0x753   :  { %5112 = vmatpush3.bf16.msra.mxu0 %v5109_v33 }
 0x754   :  { %5114 = vmatprep.subr.bf16.mxu0 %v5113_v34 }
 0x757   :  { %5116 = vmatpush3.bf16.msra.mxu0 %v5113_v34 }
 0x776   :  { %v1539_v38 = vpop.f32.mrb[12].mxu0 }
 0x777   :  { %v4812_v39 = vpop.f32.mrb[13].mxu0 }
 0x77a   :  { %v1691_v40 = vpop.f32.mrb[14].mxu0 }
 0x77b   :  { %v1463_v41 = vpop.f32.mrb[16].mxu1  ;;  %v4822_v42 = vpop.f32.mrb[15].mxu0 }
 0x77c   :  { %v4807_v43 = vpop.f32.mrb[17].mxu1  ;;  %4835 = vmatprep.mubr.msk.f32.mxu1 %vm71_vm0, %v1463_v41  ;;  %v5722_v41 = vsub.s32 2, %v5367_v5  ;;  %v2069_v42 = vsub.s32 3, %v5367_v5  ;;  %v4526_v5 = vld [vmem:[%s6119_s8 + $0xa0] sm:$0xff] }
 0x77d   :  { %4836 = vmatmul.mubr.msk.f32.vlgmr.msra.gmra.mrb[20].mxu1 %vm71_vm0, %v1539_v38 }
 0x77e   :  { %4839 = vmatpush3.msra.mxu1 %v1698_v37  ;;  %v2064_v43 = vrot.slane %v5437_v52, %v5722_v41 }
 0x77f   :  { %v1615_v44 = vpop.f32.mrb[18].mxu1  ;;  %5082 = vmatprep.subr.bf16.mxu1 %v5081_v13 }
 0x780   :  { %v4817_v46 = vpop.f32.mrb[19].mxu1  ;;  %4840 = vmatprep.mubr.msk.f32.mxu1 %vm71_vm0, %v1615_v44 }
 0x785   :  { %4841 = vmatmul.mubr.msk.f32.vlgmr.msra.gmra.mrb[20].mxu1 %vm71_vm0, %v1691_v40 }
 0x786   :  { %5084 = vmatpush3.bf16.msra.mxu1 %v5081_v13 }
 0x787   :  { %5086 = vmatprep.subr.bf16.mxu1 %v5085_v14 }
 0x78a   :  { %5088 = vmatpush3.bf16.msra.mxu1 %v5085_v14 }
 0x78b   :  { %5122 = vmatprep.subr.bf16.mxu1 %v5121_v27 }
 0x858   :  { %v4842_v47 = vpop.f32.mrb[20].mxu1 }
 0x859   :  { %v2028_v45 = vadd.f32 %v4842_v47, %v5406_v25  ;;  %v2016_v48 = vpop.f32.mrb[21].mxu1 }
 0x85a   :  { %v2027_v49 = vadd.f32 %v2016_v48, %v5408_v26 }
 0x85b   :  { %v5647_v50 = vadd.f32 %v2032_v3, %v2028_v45 }
 0x85c   :  { %v5649_v54 = vadd.f32 %v2032_v3, %v2027_v49  ;;  %v2070_v3 = vrot.slane %v5437_v52, %v2069_v42 }
 0x85d   :  { %v2038_v55 = vsel %vm236_vm5, %v5647_v50, 0.0 }
 0x85e   :  { %2039 = vadd.xlane.f32.xlu1 %v2038_v55  ;;  %v2035_v56 = vsel %vm236_vm5, %v5649_v54, 0.0 }
 0x85f   :  { %2036 = vadd.xlane.f32.xlu0 %v2035_v56 }
 0x8eb   :  { %v2040_v57 = vpop.xlane.xlu1 %2039 }
 0x8ec   :  { %v2042_v58 = vmul.f32 0.03125, %v2040_v57  ;;  %v2037_v59 = vpop.xlane.xlu0 %2036  ;;  %v2178_v57 = vld [vmem:[%s6119_s8 + $0x70] sm:$0xff] }
 0x8ed   :  { %v2041_v60 = vmul.f32 0.03125, %v2037_v59  ;;  %v2080_v59 = vrot.slane %v5641_v8, %v5440_v53 }
 0x8ee   :  { %v5656_v25 = vsub.f32 %v5647_v50, %v2042_v58  ;;  %v2179_v58 = vld [vmem:[%s6119_s8 + $0x78] sm:$0xff] }
 0x8ef   :  { %v5659_v26 = vsub.f32 %v5649_v54, %v2041_v60  ;;  %v5117_v52 = vpack.c.bf16 %v2179_v58, %v2178_v57 }
 0x8f0   :  { %v2046_v63 = vmul.f32 %v5656_v25, %v5656_v25 }
 0x8f1   :  { %v2045_v61 = vmul.f32 %v5659_v26, %v5659_v26  ;;  %5118 = vmatprep.subr.bf16.mxu0 %v5117_v52 }
 0x8f2   :  { %v2050_v1 = vsel %vm236_vm5, %v2046_v63, 0.0  ;;  %5120 = vmatpush3.bf16.msra.mxu0 %v5117_v52 }
 0x8f3   :  { %v2047_v62 = vsel %vm236_vm5, %v2045_v61, 0.0  ;;  %4925 = vmatprep.subr.mxu0 %v5286_v12 }
 0x8f4   :  { %2048 = vadd.xlane.f32.xlu0 %v2047_v62 }
 0x8f8   :  { %2051 = vadd.xlane.f32.xlu0 %v2050_v1  ;;  %v2183_v1 = vrot.slane %v5641_v8, %v5722_v41 }
 0x981   :  { %v2049_v35 = vpop.xlane.xlu0 %2048 }
 0x982   :  { %v2053_v36 = vmul.f32 0.03125, %v2049_v35  ;;  %v5777_v35 = vld [vmem:[%s6115_s3 + $0x4] sm:$0xf] }
 0x984   :  { %v2055_v37 = vadd.f32 1e-05, %v2053_v36  ;;  %v2294_v36 = vrot.slane %v5777_v35, %v5432_v51 }
 0x985   :  { %v2052_v38 = vpop.xlane.xlu0 %2051 }
 0x986   :  { %5237 = vrsqrt.f32 %v2055_v37  ;;  %v2054_v39 = vmul.f32 0.03125, %v2052_v38 }
 0x988   :  { %v2056_v40 = vadd.f32 1e-05, %v2054_v39 }
 0x98a   :  { %5239 = vrsqrt.f32 %v2056_v40 }
 0x990   :  { %v5238_v44 = vpop.eup %5237 }
 0x991   :  { %v2059_v46 = vmul.f32 %v5238_v44, %v5659_v26 }
 0x993   :  { %v2065_v47 = vmul.f32 %v2064_v43, %v2059_v46 }
 0x994   :  { %v5240_v45 = vpop.eup %5239 }
 0x995   :  { %v2060_v48 = vmul.f32 %v5240_v45, %v5656_v25  ;;  %v2071_v49 = vadd.f32 %v2070_v3, %v2065_v47 }
 0x997   :  { %v2066_v55 = vmul.f32 %v2064_v43, %v2060_v48  ;;  %4851 = vmatprep.mubr.msk.f32.mxu1 %vm236_vm5, %v2071_v49  ;;  %v2300_v43 = vrot.slane %v5777_v35, %v5440_v53 }
 0x999   :  { %v2072_v56 = vadd.f32 %v2070_v3, %v2066_v55 }
 0x99b   :  { %4852 = vmatmul.mubr.msk.f32.vlgmr.msra.gmra.mrb[22].mxu1 %vm236_vm5, %v2072_v56 }
 0x99c   :  { %5124 = vmatpush3.bf16.msra.mxu1 %v5121_v27 }
 0x99d   :  { %5126 = vmatprep.subr.bf16.mxu1 %v5125_v30 }
 0x9a0   :  { %5128 = vmatpush3.bf16.msra.mxu1 %v5125_v30 }
 0x9a1   :  { %4900 = vmatprep.subr.mxu1 %v5286_v12 }
 0xa6e   :  { %v4853_v60 = vpop.f32.mrb[22].mxu1 }
 0xa6f   :  { %v2159_v25 = vadd.f32 %v4853_v60, %v2080_v59  ;;  %v2153_v26 = vpop.f32.mrb[23].mxu1 }
 0xa70   :  { %v2154_v61 = vadd.f32 %v2153_v26, %v2080_v59 }
 0xa71   :  { %v2163_v63 = vmax.f32 %v2159_v25, 0.0 }
 0xa72   :  { %v2162_v62 = vmax.f32 %v2154_v61, 0.0 }
 0xa74   :  { %4886 = vmatprep.mubr.f32.mxu0 %v2162_v62 }
 0xa75   :  { %4887 = vmatmul.mubr.f32.vlgmr.msra.gmra.mrb[16].mxu0 %v2163_v63 }
 0xa76   :  { %4927 = vmatprep.mubr.msk.f32.mxu0 %vm5290_vm6, %v5286_v12 }
 0xb48   :  { %v4888_v10 = vpop.f32.mrb[16].mxu0 }
 0xb49   :  { %v2256_v11 = vadd.f32 %v4888_v10, %v2183_v1  ;;  %v2250_v13 = vpop.f32.mrb[17].mxu0 }
 0xb4a   :  { %v2251_v7 = vadd.f32 %v2250_v13, %v2183_v1 }
 0xb4b   :  { %v5748_v9 = vadd.f32 %v2256_v11, %v5647_v50 }
 0xb4c   :  { %v5751_v14 = vadd.f32 %v2251_v7, %v5649_v54 }
 0xb4d   :  { %v2268_v15 = vsel %vm236_vm5, %v5748_v9, 0.0 }
 0xb4e   :  { %2269 = vadd.xlane.f32.xlu0 %v2268_v15  ;;  %v2265_v16 = vsel %vm236_vm5, %v5751_v14, 0.0 }
 0xb4f   :  { %2266 = vadd.xlane.f32.xlu1 %v2265_v16 }
 0xbdb   :  { %v2270_v17 = vpop.xlane.xlu0 %2269 }
 0xbdc   :  { %v2272_v8 = vmul.f32 0.03125, %v2270_v17  ;;  %v2267_v18 = vpop.xlane.xlu1 %2266 }
 0xbdd   :  { %v2271_v19 = vmul.f32 0.03125, %v2267_v18 }
 0xbde   :  { %v2274_v2 = vsub.f32 %v5748_v9, %v2272_v8 }
 0xbdf   :  { %v2273_v50 = vsub.f32 %v5751_v14, %v2271_v19 }
 0xbe0   :  { %v2276_v0 = vmul.f32 %v2274_v2, %v2274_v2 }
 0xbe1   :  { %v2275_v20 = vmul.f32 %v2273_v50, %v2273_v50 }
 0xbe2   :  { %v2280_v54 = vsel %vm236_vm5, %v2276_v0, 0.0 }
 0xbe3   :  { %2281 = vadd.xlane.f32.xlu0 %v2280_v54  ;;  %v2277_v22 = vsel %vm236_vm5, %v2275_v20, 0.0 }
 0xbe4   :  { %2278 = vadd.xlane.f32.xlu1 %v2277_v22 }
 0xc70   :  { %v2282_v31 = vpop.xlane.xlu0 %2281 }
 0xc71   :  { %v2284_v32 = vmul.f32 0.03125, %v2282_v31  ;;  %v2279_v33 = vpop.xlane.xlu1 %2278 }
 0xc72   :  { %v2283_v6 = vmul.f32 0.03125, %v2279_v33 }
 0xc73   :  { %v2286_v4 = vadd.f32 1e-05, %v2284_v32 }
 0xc74   :  { %v2285_v34 = vadd.f32 1e-05, %v2283_v6 }
 0xc75   :  { %5241 = vrsqrt.f32 %v2286_v4 }
 0xc76   :  { %5243 = vrsqrt.f32 %v2285_v34 }
 0xc7f   :  { %v5242_v37 = vpop.eup %5241 }
 0xc80   :  { %v5244_v38 = vpop.eup %5243  ;;  %v2290_v39 = vmul.f32 %v5242_v37, %v2274_v2 }
 0xc81   :  { %v2289_v40 = vmul.f32 %v5244_v38, %v2273_v50 }
 0xc82   :  { %v2296_v44 = vmul.f32 %v2294_v36, %v2290_v39 }
 0xc83   :  { %v2295_v46 = vmul.f32 %v2294_v36, %v2289_v40 }
 0xc84   :  { %v2302_v47 = vadd.f32 %v2300_v43, %v2296_v44 }
 0xc85   :  { %v2301_v3 = vadd.f32 %v2300_v43, %v2295_v46 }
 0xc87   :  { %4897 = vmatprep.mubr.msk.f32.mxu1 %vm236_vm5, %v2301_v3 }
 0xc88   :  { %4898 = vmatmul.mubr.msk.f32.vlgmr.msra.gmra.mrb[24].mxu1 %vm236_vm5, %v2302_v47 }
 0xc89   :  { %4902 = vmatprep.mubr.msk.f32.mxu1 %vm5290_vm6, %v5286_v12 }
 0xd5b   :  { %v5787_v45 = vpop.f32.mrb[24].mxu1 }
 0xd5c   :  { %2393 = vrot.lane.b32.xlu0 %v5787_v45, %s5288_s14  ;;  %v5791_v48 = vpop.f32.mrb[25].mxu1 }
 0xd5d   :  { %2391 = vrot.lane.b32.xlu1 %v5791_v48, %s5288_s14 }
 0xd60   :  { %2399 = vrot.lane.b32.xlu0 %v5791_v48, %s5287_s2 }
 0xd61   :  { %2395 = vrot.lane.b32.xlu1 %v5791_v48, %s5289_s15 }
 0xd64   :  { %2403 = vrot.lane.b32.xlu0 %v5791_v48, %s5291_s16 }
 0xd65   :  { %2397 = vrot.lane.b32.xlu1 %v5787_v45, %s5289_s15 }
 0xd69   :  { %2401 = vrot.lane.b32.xlu1 %v5787_v45, %s5287_s2 }
 0xd6d   :  { %2479 = vrot.lane.b32.xlu1 %v5787_v45, %s5291_s16 }
 0xdce   :  { %v5807_v49 = vpop.permute.xlu0 %2393 }
 0xdcf   :  { %2631 = vrot.lane.b32.xlu1 %v5807_v49, %s5291_s16  ;;  %v5811_v55 = vpop.permute.xlu1 %2391 }
 0xdd0   :  { %2555 = vrot.lane.b32.xlu0 %v5811_v55, %s5291_s16 }
 0xdd2   :  { %v5815_v56 = vpop.permute.xlu0 %2399 }
 0xdd3   :  { %v5817_v57 = vpop.permute.xlu1 %2395 }
 0xdd4   :  { %2707 = vrot.lane.b32.xlu0 %v5817_v57, %s5291_s16 }
 0xdd6   :  { %v2404_v58 = vpop.permute.xlu0 %2403 }
 0xdd7   :  { %4901 = vmatpush3.xpose.msk.msra.mxu1 %vm71_vm0, %v2404_v58  ;;  %v5822_v52 = vpop.permute.xlu1 %2397 }
 0xdd8   :  { %2859 = vrot.lane.b32.xlu0 %v5815_v56, %s5291_s16  ;;  %2783 = vrot.lane.b32.xlu1 %v5822_v52, %s5291_s16 }
 0xdd9   :  { %4905 = vmatprep.subr.mxu1 %v5286_v12 }
 0xdda   :  { %4903 = vmatmul.mubr.msk.f32.vlgmr.msra.gmra.mrb[26].mxu1 %vm71_vm0, %v5791_v48 }
 0xddb   :  { %v5831_v59 = vpop.permute.xlu1 %2401  ;;  %4907 = vmatprep.mubr.msk.f32.mxu1 %vm5290_vm6, %v5286_v12 }
 0xddc   :  { %2935 = vrot.lane.b32.xlu1 %v5831_v59, %s5291_s16 }
 0xddf   :  { %v2480_v60 = vpop.permute.xlu1 %2479 }
 0xde0   :  { %4906 = vmatpush3.xpose.msk.msra.mxu1 %vm71_vm0, %v2480_v60 }
 0xde1   :  { %4910 = vmatprep.subr.mxu1 %v5286_v12 }
 0xde3   :  { %4908 = vmatmul.mubr.msk.f32.vlgmr.msra.gmra.mrb[28].mxu1 %vm71_vm0, %v5787_v45 }
 0xde4   :  { %4912 = vmatprep.mubr.msk.f32.mxu1 %vm5290_vm6, %v5286_v12 }
 0xe41   :  { %v2632_v26 = vpop.permute.xlu1 %2631 }
 0xe42   :  { %v2556_v25 = vpop.permute.xlu0 %2555 }
 0xe43   :  { %4911 = vmatpush3.xpose.msk.msra.mxu1 %vm71_vm0, %v2556_v25 }
 0xe44   :  { %4915 = vmatprep.subr.mxu1 %v5286_v12 }
 0xe46   :  { %4913 = vmatmul.mubr.msk.f32.vlgmr.msra.gmra.mrb[30].mxu1 %vm71_vm0, %v5811_v55  ;;  %v2708_v61 = vpop.permute.xlu0 %2707 }
 0xe47   :  { %4916 = vmatpush3.xpose.msk.msra.mxu1 %vm71_vm0, %v2632_v26  ;;  %4917 = vmatprep.mubr.msk.f32.mxu1 %vm5290_vm6, %v5286_v12 }
 0xe48   :  { %4920 = vmatprep.subr.mxu1 %v5286_v12 }
 0xe4a   :  { %4918 = vmatmul.mubr.msk.f32.vlgmr.msra.gmra.mrb[32].mxu1 %vm71_vm0, %v5807_v49  ;;  %v2784_v62 = vpop.permute.xlu1 %2783  ;;  %v2860_v63 = vpop.permute.xlu0 %2859 }
 0xe4b   :  { %4921 = vmatpush3.xpose.msk.msra.mxu1 %vm71_vm0, %v2708_v61  ;;  %4926 = vmatpush3.xpose.msk.msra.mxu0 %vm71_vm0, %v2784_v62 }
 0xe4c   :  { %4922 = vmatprep.mubr.msk.f32.mxu1 %vm5290_vm6, %v5286_v12  ;;  %4930 = vmatprep.subr.mxu1 %v5286_v12 }
 0xe4d   :  { %4935 = vmatprep.subr.mxu0 %v5286_v12 }
 0xe4e   :  { %4923 = vmatmul.mubr.msk.f32.vlgmr.msra.gmra.mrb[34].mxu1 %vm71_vm0, %v5817_v57  ;;  %4928 = vmatmul.mubr.msk.f32.vlgmr.msra.gmra.mrb[18].mxu0 %vm71_vm0, %v5822_v52  ;;  %v2936_v1 = vpop.permute.xlu1 %2935 }
 0xe4f   :  { %4931 = vmatpush3.xpose.msk.msra.mxu1 %vm71_vm0, %v2860_v63  ;;  %4936 = vmatpush3.xpose.msk.msra.mxu0 %vm71_vm0, %v2936_v1 }
 0xe50   :  { %4932 = vmatprep.mubr.msk.f32.mxu1 %vm5290_vm6, %v5286_v12  ;;  %4937 = vmatprep.mubr.msk.f32.mxu0 %vm5290_vm6, %v5286_v12 }
 0xe51   :  { %4940 = vmatprep.subr.mxu1 %v5286_v12  ;;  %4945 = vmatprep.subr.mxu0 %v5286_v12 }
 0xe52   :  { %4933 = vmatmul.mubr.msk.f32.vlgmr.msra.gmra.mrb[36].mxu1 %vm71_vm0, %v5815_v56  ;;  %4938 = vmatmul.mubr.msk.f32.vlgmr.msra.gmra.mrb[20].mxu0 %vm71_vm0, %v5831_v59 }
 0xe53   :  { %4942 = vmatprep.mubr.msk.f32.mxu1 %vm5290_vm6, %v5286_v12  ;;  %4947 = vmatprep.mubr.msk.f32.mxu0 %vm5290_vm6, %v5286_v12 }
 0xead   :  { %v2475_v10 = vpop.f32.mrb[26].mxu1 }
 0xeae   :  { %v3011_v11 = vmul.f32 0.17677669, %v2475_v10  ;;  %v4904_v13 = vpop.f32.mrb[27].mxu1 }
 0xeb0   :  { %v3019_v7 = vadd.f32 %v3011_v11, %v5541_v21 }
 0xeb2   :  { %v3027_v15 = vsel %vm71_vm0, %v3019_v7, -inf }
 0xeb3   :  { %3028 = vmax.xlane.f32.xlu0 %v3027_v15 }
 0xeb6   :  { %v2551_v16 = vpop.f32.mrb[28].mxu1 }
 0xeb7   :  { %v3012_v17 = vmul.f32 0.17677669, %v2551_v16  ;;  %v4909_v8 = vpop.f32.mrb[29].mxu1 }
 0xeb9   :  { %v3020_v18 = vadd.f32 %v3012_v17, %v5541_v21 }
 0xebb   :  { %v3030_v19 = vsel %vm71_vm0, %v3020_v18, -inf }
 0xebc   :  { %3031 = vmax.xlane.f32.xlu1 %v3030_v19 }
 0xecd   :  { %3115 = vrot.lane.b32.xlu1 %v5791_v48, %s5292_s0 }
 0xf19   :  { %v2627_v2 = vpop.f32.mrb[30].mxu1 }
 0xf1a   :  { %v3013_v50 = vmul.f32 0.17677669, %v2627_v2  ;;  %v4914_v0 = vpop.f32.mrb[31].mxu1 }
 0xf1c   :  { %v3021_v20 = vadd.f32 %v3013_v50, %v5541_v21 }
 0xf1d   :  { %v2703_v54 = vpop.f32.mrb[32].mxu1 }
 0xf1e   :  { %v3014_v22 = vmul.f32 0.17677669, %v2703_v54  ;;  %v4919_v23 = vpop.f32.mrb[33].mxu1  ;;  %v3033_v24 = vsel %vm71_vm0, %v3021_v20, -inf }
 0xf1f   :  { %3034 = vmax.xlane.f32.xlu0 %v3033_v24 }
 0xf20   :  { %v3022_v27 = vadd.f32 %v3014_v22, %v5541_v21 }
 0xf21   :  { %v2779_v28 = vpop.f32.mrb[34].mxu1  ;;  %v2855_v29 = vpop.f32.mrb[18].mxu0 }
 0xf22   :  { %v3015_v30 = vmul.f32 0.17677669, %v2779_v28  ;;  %v3016_v31 = vmul.f32 0.17677669, %v2855_v29  ;;  %v4924_v32 = vpop.f32.mrb[35].mxu1  ;;  %v4929_v33 = vpop.f32.mrb[19].mxu0 }
 0xf23   :  { %v3036_v6 = vsel %vm71_vm0, %v3022_v27, -inf }
 0xf24   :  { %3037 = vmax.xlane.f32.xlu0 %v3036_v6  ;;  %v5890_v4 = vadd.f32 %v3015_v30, %v5541_v21  ;;  %v3024_v34 = vadd.f32 %v3016_v31, %v5541_v21 }
 0xf25   :  { %v2931_v36 = vpop.f32.mrb[36].mxu1  ;;  %v3007_v37 = vpop.f32.mrb[20].mxu0 }
 0xf26   :  { %v3017_v38 = vmul.f32 0.17677669, %v2931_v36  ;;  %v3018_v39 = vmul.f32 0.17677669, %v3007_v37  ;;  %v4934_v40 = vpop.f32.mrb[37].mxu1  ;;  %v4939_v43 = vpop.f32.mrb[21].mxu0 }
 0xf27   :  { %v3039_v44 = vsel %vm71_vm0, %v5890_v4, -inf  ;;  %v3042_v46 = vsel %vm71_vm0, %v3024_v34, -inf }
 0xf28   :  { %3040 = vmax.xlane.f32.xlu1 %v3039_v44  ;;  %3043 = vmax.xlane.f32.xlu0 %v3042_v46  ;;  %v5897_v3 = vadd.f32 %v3017_v38, %v5541_v21  ;;  %v3026_v47 = vadd.f32 %v3018_v39, %v5541_v21 }
 0xf2a   :  { %v3045_v48 = vsel %vm71_vm0, %v5897_v3, -inf  ;;  %v3048_v58 = vsel %vm71_vm0, %v3026_v47, -inf }
 0xf2c   :  { %3046 = vmax.xlane.f32.xlu1 %v3045_v48  ;;  %3049 = vmax.xlane.f32.xlu0 %v3048_v58 }
 0xf3d   :  { %3267 = vrot.lane.b32.xlu1 %v5811_v55, %s5292_s0 }
 0xf40   :  { %v3029_v60 = vpop.xlane.xlu0 %3028 }
 0xf41   :  { %v3051_v26 = vsub.f32 %v3019_v7, %v3029_v60 }
 0xf42   :  { %3191 = vrot.lane.b32.xlu0 %v5787_v45, %s5292_s0 }
 0xf43   :  { %v3059_v63 = vmul.f32 1.442695, %v3051_v26 }
 0xf45   :  { %5245 = vpow2.f32 %v3059_v63 }
 0xf49   :  { %v3032_v25 = vpop.xlane.xlu1 %3031 }
 0xf4a   :  { %v3052_v61 = vsub.f32 %v3020_v18, %v3032_v25 }
 0xf4c   :  { %v3061_v21 = vmul.f32 1.442695, %v3052_v61 }
 0xf4d   :  { %v3116_v62 = vpop.permute.xlu1 %3115 }
 0xf4e   :  { %4941 = vmatpush3.msra.mxu1 %v3116_v62  ;;  %5247 = vpow2.f32 %v3061_v21 }
 0xf4f   :  { %4950 = vmatprep.subr.mxu1 %v5286_v12  ;;  %v5908_v1 = vpop.eup %5245 }
 0xf50   :  { %v3075_v55 = vsel %vm71_vm0, %v5908_v1, 0.0 }
 0xf58   :  { %v5248_v10 = vpop.eup %5247 }
 0xf59   :  { %v3078_v45 = vsel %vm71_vm0, %v5248_v10, 0.0 }
 0xf61   :  { %3076 = vadd.xlane.f32.xlu1 %v3075_v55  ;;  %3079 = vadd.xlane.f32.xlu0 %v3078_v45 }
 0xfac   :  { %v3035_v11 = vpop.xlane.xlu0 %3034 }
 0xfad   :  { %v3053_v13 = vsub.f32 %v3021_v20, %v3035_v11 }
 0xfaf   :  { %v3063_v7 = vmul.f32 1.442695, %v3053_v13 }
 0xfb1   :  { %5249 = vpow2.f32 %v3063_v7  ;;  %v3038_v15 = vpop.xlane.xlu0 %3037 }
 0xfb2   :  { %v3054_v8 = vsub.f32 %v3022_v27, %v3038_v15 }
 0xfb4   :  { %v3065_v0 = vmul.f32 1.442695, %v3054_v8  ;;  %v4505_v8 = vld [vmem:[%s6116_s5 + $0x28] sm:$0xff] }
 0xfb5   :  { %v3044_v16 = vpop.xlane.xlu0 %3043  ;;  %v3041_v31 = vpop.xlane.xlu1 %3040 }
 0xfb6   :  { %v3056_v17 = vsub.f32 %v3024_v34, %v3044_v16  ;;  %v3055_v32 = vsub.f32 %v5890_v4, %v3041_v31 }
 0xfb8   :  { %v3069_v18 = vmul.f32 1.442695, %v3056_v17  ;;  %v3067_v6 = vmul.f32 1.442695, %v3055_v32 }
 0xfb9   :  { %v3050_v19 = vpop.xlane.xlu0 %3049  ;;  %v3047_v33 = vpop.xlane.xlu1 %3046 }
 0xfba   :  { %5251 = vpow2.f32 %v3069_v18  ;;  %v3058_v2 = vsub.f32 %v3026_v47, %v3050_v19  ;;  %v3057_v34 = vsub.f32 %v5897_v3, %v3047_v33  ;;  %v4504_v18 = vld [vmem:[%s6116_s5 + $0x20] sm:$0xff] }
 0xfbb   :  { %v5250_v50 = vpop.eup %5249 }
 0xfbc   :  { %v3073_v54 = vmul.f32 1.442695, %v3058_v2  ;;  %v3081_v22 = vsel %vm71_vm0, %v5250_v50, 0.0  ;;  %v3071_v36 = vmul.f32 1.442695, %v3057_v34 }
 0xfbd   :  { %v3192_v23 = vpop.permute.xlu0 %3191  ;;  %3082 = vadd.xlane.f32.xlu1 %v3081_v22  ;;  %v3268_v37 = vpop.permute.xlu1 %3267  ;;  %v5988_v34 = vld [vmem:[%s6117_s6 + $0x4] sm:$0x7] }
 0xfbe   :  { %5253 = vpow2.f32 %v3073_v54  ;;  %4946 = vmatpush3.msra.mxu0 %v3192_v23  ;;  %v4506_v23 = vld [vmem:[%s6116_s5 + $0x30] sm:$0xff] }
 0xfbf   :  { %4955 = vmatprep.subr.mxu0 %v5286_v12  ;;  %5255 = vpow2.f32 %v3065_v0 }
 0xfc0   :  { %5257 = vpow2.f32 %v3067_v6 }
 0xfc1   :  { %5259 = vpow2.f32 %v3071_v36  ;;  %v4061_v36 = vrot.slane %v5988_v34, %v5432_v51 }
 0xfc4   :  { %v5915_v20 = vpop.eup %5251 }
 0xfc5   :  { %v3090_v24 = vsel %vm71_vm0, %v5915_v20, 0.0 }
 0xfc6   :  { %3091 = vadd.xlane.f32.xlu0 %v3090_v24 }
 0xfc8   :  { %v5919_v27 = vpop.eup %5253 }
 0xfc9   :  { %v3096_v28 = vsel %vm71_vm0, %v5919_v27, 0.0  ;;  %v5256_v29 = vpop.eup %5255 }
 0xfca   :  { %3097 = vadd.xlane.f32.xlu0 %v3096_v28  ;;  %v3084_v30 = vsel %vm71_vm0, %v5256_v29, 0.0  ;;  %v4507_v28 = vld [vmem:[%s6116_s5 + $0x38] sm:$0xff] }
 0xfce   :  { %3085 = vadd.xlane.f32.xlu0 %v3084_v30  ;;  %3419 = vrot.lane.b32.xlu1 %v5817_v57, %s5292_s0 }
 0xfd2   :  { %3495 = vrot.lane.b32.xlu1 %v5822_v52, %s5292_s0  ;;  %v5258_v52 = vpop.eup %5257 }
 0xfd3   :  { %v3087_v4 = vsel %vm71_vm0, %v5258_v52, 0.0  ;;  %v5260_v39 = vpop.eup %5259 }
 0xfd4   :  { %v3093_v43 = vsel %vm71_vm0, %v5260_v39, 0.0 }
 0xfe4   :  { %3343 = vrot.lane.b32.xlu0 %v5807_v49, %s5292_s0 }
 0xfe8   :  { %3571 = vrot.lane.b32.xlu0 %v5815_v56, %s5292_s0 }
 0xfee   :  { %v3080_v57 = vpop.xlane.xlu0 %3079  ;;  %v3077_v38 = vpop.xlane.xlu1 %3076 }
 0xfef   :  { %5261 = vrcp.f32 %v3080_v57 }
 0xff0   :  { %5263 = vrcp.f32 %v3077_v38 }
 0xff6   :  { %3088 = vadd.xlane.f32.xlu1 %v3087_v4 }
 0xff9   :  { %v5262_v40 = vpop.eup %5261 }
 0xffa   :  { %v5264_v49 = vpop.eup %5263  ;;  %v3108_v44 = vmul.f32 %v5262_v40, %v5248_v10  ;;  %3094 = vadd.xlane.f32.xlu1 %v3093_v43 }
 0xffb   :  { %v3107_v46 = vmul.f32 %v5264_v49, %v5908_v1 }
 0xffc   :  { %4948 = vmatmul.mubr.msk.f32.vlgmr.msra.gmra.mrb[22].mxu0 %vm71_vm0, %v3108_v44 }
 0xffd   :  { %4943 = vmatmul.mubr.msk.f32.vlgmr.msra.gmra.mrb[38].mxu1 %vm71_vm0, %v3107_v46  ;;  %4957 = vmatprep.mubr.msk.f32.mxu0 %vm5290_vm6, %v5286_v12 }
 0xffe   :  { %4951 = vmatpush3.msra.mxu1 %v3268_v37  ;;  %4952 = vmatprep.mubr.msk.f32.mxu1 %vm5290_vm6, %v5286_v12 }
 0xfff   :  { %4960 = vmatprep.subr.mxu1 %v5286_v12 }
0x100b   :  { %3647 = vrot.lane.b32.xlu1 %v5831_v59, %s5292_s0 }
0x104a   :  { %v3083_v56 = vpop.xlane.xlu1 %3082 }
0x104b   :  { %5265 = vrcp.f32 %v3083_v56 }
0x104e   :  { %v3420_v60 = vpop.permute.xlu1 %3419 }
0x1052   :  { %v3496_v63 = vpop.permute.xlu1 %3495 }
0x1053   :  { %v3092_v3 = vpop.xlane.xlu0 %3091 }
0x1055   :  { %v5266_v47 = vpop.eup %5265 }
0x1056   :  { %v3109_v48 = vmul.f32 %v5266_v47, %v5250_v50 }
0x1057   :  { %v3098_v58 = vpop.xlane.xlu0 %3097 }
0x1058   :  { %4953 = vmatmul.mubr.msk.f32.vlgmr.msra.gmra.mrb[40].mxu1 %vm71_vm0, %v3109_v48 }
0x1059   :  { %4961 = vmatpush3.msra.mxu1 %v3420_v60  ;;  %4962 = vmatprep.mubr.msk.f32.mxu1 %vm5290_vm6, %v5286_v12  ;;  %v4516_v60 = vld [vmem:[%s6118_s7 + $0x20] sm:$0xff] }
0x105a   :  { %4970 = vmatprep.subr.mxu1 %v5286_v12 }
0x105b   :  { %v3086_v25 = vpop.xlane.xlu0 %3085 }
0x105c   :  { %5267 = vrcp.f32 %v3086_v25  ;;  %v4517_v25 = vld [vmem:[%s6118_s7 + $0x28] sm:$0xff] }
0x105d   :  { %5269 = vrcp.f32 %v3092_v3 }
0x105e   :  { %5271 = vrcp.f32 %v3098_v58 }
0x105f   :  { %v3344_v26 = vpop.permute.xlu0 %3343 }
0x1060   :  { %4956 = vmatpush3.msra.mxu0 %v3344_v26  ;;  %v5129_v26 = vpack.c.bf16 %v4517_v25, %v4516_v60 }
0x1061   :  { %4965 = vmatprep.subr.mxu0 %v5286_v12 }
0x1063   :  { %v3572_v15 = vpop.permute.xlu0 %3571 }
0x1066   :  { %v5268_v59 = vpop.eup %5267 }
0x1067   :  { %v3110_v61 = vmul.f32 %v5268_v59, %v5256_v29  ;;  %v5270_v62 = vpop.eup %5269  ;;  %v4518_v59 = vld [vmem:[%s6118_s7 + $0x30] sm:$0xff] }
0x1068   :  { %v3112_v21 = vmul.f32 %v5270_v62, %v5915_v20  ;;  %v5272_v55 = vpop.eup %5271 }
0x1069   :  { %4958 = vmatmul.mubr.msk.f32.vlgmr.msra.gmra.mrb[24].mxu0 %vm71_vm0, %v3110_v61  ;;  %v3114_v45 = vmul.f32 %v5272_v55, %v5919_v27  ;;  %v4519_v61 = vld [vmem:[%s6118_s7 + $0x38] sm:$0xff] }
0x106a   :  { %4966 = vmatpush3.msra.mxu0 %v3496_v63  ;;  %4967 = vmatprep.mubr.msk.f32.mxu0 %vm5290_vm6, %v5286_v12  ;;  %v5133_v62 = vpack.c.bf16 %v4519_v61, %v4518_v59  ;;  %v4522_v63 = vld [vmem:[%s6119_s8 + $0x80] sm:$0xff] }
0x106b   :  { %4975 = vmatprep.subr.mxu0 %v5286_v12 }
0x106d   :  { %4968 = vmatmul.mubr.msk.f32.vlgmr.msra.gmra.mrb[26].mxu0 %vm71_vm0, %v3112_v21  ;;  %v4523_v21 = vld [vmem:[%s6119_s8 + $0x88] sm:$0xff] }
0x106e   :  { %4977 = vmatprep.mubr.msk.f32.mxu0 %vm5290_vm6, %v5286_v12 }
0x1083   :  { %v3089_v1 = vpop.xlane.xlu1 %3088 }
0x1084   :  { %5273 = vrcp.f32 %v3089_v1  ;;  %v5137_v1 = vpack.c.bf16 %v4523_v21, %v4522_v63 }
0x1087   :  { %v3095_v10 = vpop.xlane.xlu1 %3094 }
0x1088   :  { %5275 = vrcp.f32 %v3095_v10 }
0x108b   :  { %v3648_v11 = vpop.permute.xlu1 %3647 }
0x108c   :  { %4976 = vmatpush3.msra.mxu0 %v3648_v11 }
0x108d   :  { %4978 = vmatmul.mubr.msk.f32.vlgmr.msra.gmra.mrb[28].mxu0 %vm71_vm0, %v3114_v45  ;;  %5130 = vmatprep.subr.bf16.mxu0 %v5129_v26 }
0x108e   :  { %v5274_v13 = vpop.eup %5273  ;;  %5132 = vmatpush3.bf16.msra.mxu0 %v5129_v26 }
0x108f   :  { %v3111_v7 = vmul.f32 %v5274_v13, %v5258_v52  ;;  %5134 = vmatprep.subr.bf16.mxu0 %v5133_v62 }
0x1091   :  { %4963 = vmatmul.mubr.msk.f32.vlgmr.msra.gmra.mrb[42].mxu1 %vm71_vm0, %v3111_v7 }
0x1092   :  { %v5276_v16 = vpop.eup %5275  ;;  %4971 = vmatpush3.msra.mxu1 %v3572_v15  ;;  %4972 = vmatprep.mubr.msk.f32.mxu1 %vm5290_vm6, %v5286_v12  ;;  %v4093_v15 = vrot.slane %v5777_v35, %v5722_v41 }
0x1093   :  { %v3113_v17 = vmul.f32 %v5276_v16, %v5260_v39  ;;  %4980 = vmatprep.subr.mxu1 %v4505_v8  ;;  %5136 = vmatpush3.bf16.msra.mxu0 %v5133_v62 }
0x1094   :  { %5138 = vmatprep.subr.bf16.mxu0 %v5137_v1 }
0x1095   :  { %4973 = vmatmul.mubr.msk.f32.vlgmr.msra.gmra.mrb[44].mxu1 %vm71_vm0, %v3113_v17 }
0x1096   :  { %4981 = vmatpush3.msra.mxu1 %v4505_v8  ;;  %v4099_v8 = vrot.slane %v5777_v35, %v2069_v42  ;;  %v4527_v42 = vld [vmem:[%s6119_s8 + $0xa8] sm:$0xff] }
0x1097   :  { %4985 = vmatprep.subr.mxu1 %v4504_v18  ;;  %v5145_v35 = vpack.c.bf16 %v4527_v42, %v4526_v5 }
0x10cf   :  { %v3263_v19 = vpop.f32.mrb[22].mxu0 }
0x10d0   :  { %v3187_v2 = vpop.f32.mrb[38].mxu1  ;;  %v4949_v50 = vpop.f32.mrb[23].mxu0 }
0x10d1   :  { %v4944_v0 = vpop.f32.mrb[39].mxu1 }
0x10d2   :  { %v4524_v0 = vld [vmem:[%s6119_s8 + $0x90] sm:$0xff] }
0x112b   :  { %v3339_v54 = vpop.f32.mrb[40].mxu1 }
0x112c   :  { %v4954_v12 = vpop.f32.mrb[41].mxu1  ;;  %4982 = vmatprep.mubr.msk.f32.mxu1 %vm71_vm0, %v3339_v54  ;;  %v4525_v54 = vld [vmem:[%s6119_s8 + $0x98] sm:$0xff] }
0x113c   :  { %v3415_v22 = vpop.f32.mrb[24].mxu0 }
0x113d   :  { %v4959_v20 = vpop.f32.mrb[25].mxu0  ;;  %4983 = vmatmul.mubr.msk.f32.vlgmr.msra.gmra.mrb[46].mxu1 %vm71_vm0, %v3415_v22 }
0x113e   :  { %4987 = vmatprep.mubr.msk.f32.mxu1 %vm71_vm0, %v3187_v2  ;;  %4986 = vmatpush3.msra.mxu1 %v4504_v18  ;;  %v4528_v20 = vld [vmem:[%s6119_s8 + $0xb0] sm:$0xff] }
0x113f   :  { %4990 = vmatprep.subr.mxu1 %v4506_v23 }
0x1140   :  { %v3567_v24 = vpop.f32.mrb[26].mxu0 }
0x1141   :  { %v4969_v27 = vpop.f32.mrb[27].mxu0 }
0x1145   :  { %4988 = vmatmul.mubr.msk.f32.vlgmr.msra.gmra.mrb[46].mxu1 %vm71_vm0, %v3263_v19 }
0x1146   :  { %4991 = vmatpush3.msra.mxu1 %v4506_v23  ;;  %v5141_v23 = vpack.c.bf16 %v4525_v54, %v4524_v0 }
0x1147   :  { %4995 = vmatprep.subr.mxu1 %v4507_v28 }
0x1160   :  { %v3719_v29 = vpop.f32.mrb[28].mxu0 }
0x1161   :  { %v4979_v30 = vpop.f32.mrb[29].mxu0 }
0x1164   :  { %v3491_v31 = vpop.f32.mrb[42].mxu1 }
0x1165   :  { %v4964_v32 = vpop.f32.mrb[43].mxu1  ;;  %4992 = vmatprep.mubr.msk.f32.mxu1 %vm71_vm0, %v3491_v31  ;;  %v4532_v31 = vld [vmem:[%s6119_s8 + $0xd0] sm:$0xff] }
0x1166   :  { %4993 = vmatmul.mubr.msk.f32.vlgmr.msra.gmra.mrb[46].mxu1 %vm71_vm0, %v3567_v24  ;;  %v4529_v24 = vld [vmem:[%s6119_s8 + $0xb8] sm:$0xff] }
0x1167   :  { %4996 = vmatpush3.msra.mxu1 %v4507_v28  ;;  %v5149_v27 = vpack.c.bf16 %v4529_v24, %v4528_v20  ;;  %v4530_v28 = vld [vmem:[%s6119_s8 + $0xc0] sm:$0xff]  ;;  %v4533_v32 = vld [vmem:[%s6119_s8 + $0xd8] sm:$0xff] }
0x1168   :  { %v3643_v33 = vpop.f32.mrb[44].mxu1 }
0x1169   :  { %v4974_v6 = vpop.f32.mrb[45].mxu1  ;;  %4997 = vmatprep.mubr.msk.f32.mxu1 %vm71_vm0, %v3643_v33  ;;  %v5157_v33 = vpack.c.bf16 %v4533_v32, %v4532_v31 }
0x116a   :  { %v4534_v6 = vld [vmem:[%s6119_s8 + $0xe0] sm:$0xff] }
0x116e   :  { %4998 = vmatmul.mubr.msk.f32.vlgmr.msra.gmra.mrb[46].mxu1 %vm71_vm0, %v3719_v29  ;;  %v4531_v29 = vld [vmem:[%s6119_s8 + $0xc8] sm:$0xff] }
0x116f   :  { %v5153_v30 = vpack.c.bf16 %v4531_v29, %v4530_v28 }
0x1241   :  { %v4999_v37 = vpop.f32.mrb[46].mxu1 }
0x1242   :  { %v4057_v57 = vadd.f32 %v4999_v37, %v5748_v9  ;;  %v4045_v38 = vpop.f32.mrb[47].mxu1 }
0x1243   :  { %v4056_v52 = vadd.f32 %v4045_v38, %v5751_v14  ;;  %v4537_v38 = vld [vmem:[%s6119_s8 + $0xf8] sm:$0xff] }
0x1244   :  { %v5994_v4 = vadd.f32 %v4061_v36, %v4057_v57  ;;  %v4536_v57 = vld [vmem:[%s6119_s8 + $0xf0] sm:$0xff] }
0x1245   :  { %v5996_v39 = vadd.f32 %v4061_v36, %v4056_v52  ;;  %v4535_v36 = vld [vmem:[%s6119_s8 + $0xe8] sm:$0xff]  ;;  %v5165_v52 = vpack.c.bf16 %v4537_v38, %v4536_v57 }
0x1246   :  { %v4067_v40 = vsel %vm236_vm5, %v5994_v4, 0.0  ;;  %v5161_v37 = vpack.c.bf16 %v4535_v36, %v4534_v6 }
0x1247   :  { %4068 = vadd.xlane.f32.xlu1 %v4067_v40  ;;  %v4064_v43 = vsel %vm236_vm5, %v5996_v39, 0.0  ;;  %v4110_v40 = vrot.slane %v5988_v34, %v5440_v53 }
0x1248   :  { %4065 = vadd.xlane.f32.xlu0 %v4064_v43 }
0x12d4   :  { %v4069_v49 = vpop.xlane.xlu1 %4068 }
0x12d5   :  { %v4071_v44 = vmul.f32 0.03125, %v4069_v49  ;;  %v4066_v46 = vpop.xlane.xlu0 %4065 }
0x12d6   :  { %v4070_v56 = vmul.f32 0.03125, %v4066_v46 }
0x12d7   :  { %v4073_v9 = vsub.f32 %v5994_v4, %v4071_v44 }
0x12d8   :  { %v4072_v14 = vsub.f32 %v5996_v39, %v4070_v56 }
0x12d9   :  { %v4075_v48 = vmul.f32 %v4073_v9, %v4073_v9 }
0x12da   :  { %v4074_v3 = vmul.f32 %v4072_v14, %v4072_v14 }
0x12db   :  { %v4079_v58 = vsel %vm236_vm5, %v4075_v48, 0.0 }
0x12dc   :  { %v4076_v47 = vsel %vm236_vm5, %v4074_v3, 0.0 }
0x12dd   :  { %4077 = vadd.xlane.f32.xlu0 %v4076_v47 }
0x12e1   :  { %4080 = vadd.xlane.f32.xlu0 %v4079_v58 }
0x136a   :  { %v4078_v10 = vpop.xlane.xlu0 %4077 }
0x136b   :  { %v4082_v55 = vmul.f32 0.03125, %v4078_v10 }
0x136d   :  { %v4084_v45 = vadd.f32 1e-05, %v4082_v55 }
0x136e   :  { %v4081_v11 = vpop.xlane.xlu0 %4080 }
0x136f   :  { %5277 = vrsqrt.f32 %v4084_v45  ;;  %v4083_v13 = vmul.f32 0.03125, %v4081_v11  ;;  %v4332_v45 = vld [vmem:[%s6120_s10 + $0x8] sm:$0xff]  ;;  %v4333_v11 = vld [vmem:[%s6120_s10 + $0x10] sm:$0xff] }
0x1371   :  { %v4085_v7 = vadd.f32 1e-05, %v4083_v13 }
0x1373   :  { %5279 = vrsqrt.f32 %v4085_v7  ;;  %v4334_v7 = vld [vmem:[%s6120_s10 + $0x18] sm:$0xff] }
0x1379   :  { %v5278_v16 = vpop.eup %5277 }
0x137a   :  { %v4088_v17 = vmul.f32 %v5278_v16, %v4072_v14  ;;  %v4214_v14 = vrot.slane %v5988_v34, %v5722_v41 }
0x137c   :  { %v4094_v18 = vmul.f32 %v4093_v15, %v4088_v17 }
0x137d   :  { %v5280_v19 = vpop.eup %5279 }
0x137e   :  { %v4089_v2 = vmul.f32 %v5280_v19, %v4073_v9  ;;  %v4100_v50 = vadd.f32 %v4099_v8, %v4094_v18 }
0x1380   :  { %v4095_v12 = vmul.f32 %v4093_v15, %v4089_v2  ;;  %5008 = vmatprep.mubr.msk.f32.mxu0 %vm236_vm5, %v4100_v50  ;;  %v5173_v15 = vpack.c.bf16 %v4334_v7, %v4333_v11  ;;  %v4292_v50 = vld [vmem:[%s6121_s9] sm:$0x3] }
0x1381   :  { %v4322_v0 = vrot.slane %v4292_v50, %v5432_v51  ;;  %v4328_v5 = vrot.slane %v4292_v50, %v5440_v53 }
0x1382   :  { %v4101_v22 = vadd.f32 %v4099_v8, %v4095_v12 }
0x1384   :  { %5009 = vmatmul.mubr.msk.f32.vlgmr.msra.gmra.mrb[30].mxu0 %vm236_vm5, %v4101_v22 }
0x1385   :  { %5140 = vmatpush3.bf16.msra.mxu0 %v5137_v1 }
0x1386   :  { %5142 = vmatprep.subr.bf16.mxu0 %v5141_v23 }
0x1389   :  { %5144 = vmatpush3.bf16.msra.mxu0 %v5141_v23 }
0x138a   :  { %5146 = vmatprep.subr.bf16.mxu0 %v5145_v35 }
0x138d   :  { %5148 = vmatpush3.bf16.msra.mxu0 %v5145_v35 }
0x138e   :  { %5150 = vmatprep.subr.bf16.mxu0 %v5149_v27 }
0x1391   :  { %5152 = vmatpush3.bf16.msra.mxu0 %v5149_v27  ;;  %v4538_v27 = vld [vmem:[%s6122_s11] ss:$0 sm:$0xff] }
0x1392   :  { %5154 = vmatprep.subr.bf16.mxu0 %v5153_v30 }
0x1395   :  { %5156 = vmatpush3.bf16.msra.mxu0 %v5153_v30 }
0x1396   :  { %5158 = vmatprep.subr.bf16.mxu0 %v5157_v33 }
0x1399   :  { %5160 = vmatpush3.bf16.msra.mxu0 %v5157_v33 }
0x139a   :  { %5162 = vmatprep.subr.bf16.mxu0 %v5161_v37 }
0x139d   :  { %5164 = vmatpush3.bf16.msra.mxu0 %v5161_v37 }
0x139e   :  { %5166 = vmatprep.subr.bf16.mxu0 %v5165_v52 }
0x13a1   :  { %5168 = vmatpush3.bf16.msra.mxu0 %v5165_v52 }
0x1457   :  { %v5010_v43 = vpop.f32.mrb[30].mxu0 }
0x1458   :  { %v4189_v49 = vadd.f32 %v5010_v43, %v4110_v40  ;;  %v4183_v44 = vpop.f32.mrb[31].mxu0 }
0x1459   :  { %v4184_v46 = vadd.f32 %v4183_v44, %v4110_v40 }
0x145a   :  { %v4193_v9 = vmax.f32 %v4189_v49, 0.0 }
0x145b   :  { %v4192_v56 = vmax.f32 %v4184_v46, 0.0 }
0x145d   :  { %5043 = vmatprep.mubr.f32.mxu0 %v4192_v56 }
0x145e   :  { %5044 = vmatmul.mubr.f32.vlgmr.msra.gmra.mrb[32].mxu0 %v4193_v9 }
0x1531   :  { %v5045_v3 = vpop.f32.mrb[32].mxu0 }
0x1532   :  { %v4287_v47 = vadd.f32 %v5045_v3, %v4214_v14  ;;  %v4281_v48 = vpop.f32.mrb[33].mxu0 }
0x1533   :  { %v4282_v58 = vadd.f32 %v4281_v48, %v4214_v14 }
0x1534   :  { %v4291_v60 = vadd.f32 %v4287_v47, %v5994_v4 }
0x1535   :  { %v4290_v25 = vadd.f32 %v4282_v58, %v5996_v39  ;;  %v4331_v39 = vld [vmem:[%s6120_s10] sm:$0xff] }
0x1536   :  { %v4296_v26 = vsel %vm236_vm5, %v4291_v60, 0.0  ;;  %v5169_v13 = vpack.c.bf16 %v4332_v45, %v4331_v39 }
0x1537   :  { %4297 = vadd.xlane.f32.xlu0 %v4296_v26  ;;  %v4293_v59 = vsel %vm236_vm5, %v4290_v25, 0.0 }
0x1538   :  { %4294 = vadd.xlane.f32.xlu1 %v4293_v59  ;;  %5170 = vmatprep.subr.bf16.mxu1 %v5169_v13 }
0x1539   :  { %5172 = vmatpush3.bf16.msra.mxu1 %v5169_v13 }
0x153a   :  { %5174 = vmatprep.subr.bf16.mxu1 %v5173_v15 }
0x153d   :  { %5176 = vmatpush3.bf16.msra.mxu1 %v5173_v15 }
0x15c4   :  { %v4298_v61 = vpop.xlane.xlu0 %4297 }
0x15c5   :  { %v4300_v62 = vmul.f32 0.03125, %v4298_v61  ;;  %v4295_v63 = vpop.xlane.xlu1 %4294 }
0x15c6   :  { %v4299_v21 = vmul.f32 0.03125, %v4295_v63 }
0x15c7   :  { %v4302_v1 = vsub.f32 %v4291_v60, %v4300_v62 }
0x15c8   :  { %v4301_v41 = vsub.f32 %v4290_v25, %v4299_v21 }
0x15c9   :  { %v4304_v34 = vmul.f32 %v4302_v1, %v4302_v1 }
0x15ca   :  { %v4303_v10 = vmul.f32 %v4301_v41, %v4301_v41 }
0x15cb   :  { %v4308_v55 = vsel %vm236_vm5, %v4304_v34, 0.0 }
0x15cc   :  { %4309 = vadd.xlane.f32.xlu0 %v4308_v55  ;;  %v4305_v4 = vsel %vm236_vm5, %v4303_v10, 0.0 }
0x15cd   :  { %4306 = vadd.xlane.f32.xlu1 %v4305_v4 }
0x1659   :  { %v4310_v16 = vpop.xlane.xlu0 %4309 }
0x165a   :  { %v4312_v17 = vmul.f32 0.03125, %v4310_v16  ;;  %v4307_v8 = vpop.xlane.xlu1 %4306 }
0x165b   :  { %v4311_v18 = vmul.f32 0.03125, %v4307_v8 }
0x165c   :  { %v4314_v19 = vadd.f32 1e-05, %v4312_v17 }
0x165d   :  { %v4313_v2 = vadd.f32 1e-05, %v4311_v18 }
0x165e   :  { %5281 = vrsqrt.f32 %v4314_v19 }
0x165f   :  { %5283 = vrsqrt.f32 %v4313_v2 }
0x1668   :  { %v5282_v54 = vpop.eup %5281 }
0x1669   :  { %v5284_v12 = vpop.eup %5283  ;;  %v4318_v22 = vmul.f32 %v5282_v54, %v4302_v1 }
0x166a   :  { %v4317_v23 = vmul.f32 %v5284_v12, %v4301_v41 }
0x166b   :  { %v4324_v42 = vmul.f32 %v4322_v0, %v4318_v22 }
0x166c   :  { %v4323_v35 = vmul.f32 %v4322_v0, %v4317_v23 }
0x166d   :  { %v4330_v24 = vadd.f32 %v4328_v5, %v4324_v42 }
0x166e   :  { %v4329_v20 = vadd.f32 %v4328_v5, %v4323_v35 }
0x1670   :  { %5054 = vmatprep.mubr.msk.f32.mxu1 %vm236_vm5, %v4329_v20 }
0x1671   :  { %5055 = vmatmul.mubr.msk.f32.vlgmr.msra.gmra.mrb[48].mxu1 %vm236_vm5, %v4330_v24 }
0x1744   :  { %v5056_v28 = vpop.f32.mrb[48].mxu1 }
0x1745   :  { %v4420_v51 = vadd.f32 %v5056_v28, %v4538_v27  ;;  %v4414_v29 = vpop.f32.mrb[49].mxu1 }
0x1746   :  { %v4415_v30 = vadd.f32 %v4538_v27, %v4414_v29 }
0x1747   :  { %4424 = vst [vmem:[%s6123_s12 + $0x8] sm:$0xff] %v4420_v51 }
0x1748   :  { %4423 = vst [vmem:[%s6123_s12] sm:$0xff] %v4415_v30 }

</bundles_post_ra>
